<compile_context>
chip_gen: v7x
topology: tpu7x:2x2x1
jax: 0.10.0
libtpu: 0.0.40
codegen_flags: <defaults>
</compile_context>

<pallas_src>
import functools
import math

import jax
import jax.numpy as jnp
from jax.experimental import pallas as pl
from jax.experimental.pallas import tpu as pltpu

# ---- small synthetic config (module's config is 768/12/12/3072; scaled down) ----
VOCAB = 100
HIDDEN = 32
NHEADS = 4
HEAD_DIM = HIDDEN // NHEADS
INTERMEDIATE = 64
NLAYERS = 2
MAX_POS = 16
NTYPES = 2
NUM_LABELS = 2
LN_EPS = 1e-12

_GELU_C = 0.7978845608028654  # sqrt(2/pi)


def _pick_vmem_limit():
    """Generation-aware scoped-VMEM limit (don't hardcode 32 MiB everywhere)."""
    try:
        info = pltpu.get_tpu_info()
        cap = getattr(info, "vmem_capacity_bytes", None)
        if cap:
            # leave headroom below physical VMEM (64 MiB on v7x, 128 MiB on v5e/v6e)
            return int(min(int(cap) * 3 // 4, 100 * 1024 * 1024))
    except Exception:
        pass
    return 32 * 1024 * 1024


VMEM_LIMIT = _pick_vmem_limit()


def _gelu(y):
    # TODO(synk): HF "gelu" is erf-based; using the tanh approximation in-kernel.
    return 0.5 * y * (1.0 + jnp.tanh(_GELU_C * (y + 0.044715 * y * y * y)))


def _layer_norm(x, g, b, eps):
    mu = jnp.mean(x, axis=-1, keepdims=True)
    var = jnp.mean((x - mu) ** 2, axis=-1, keepdims=True)
    return (x - mu) * jax.lax.rsqrt(var + eps) * g + b


def _mxu_dot(a, b):
    # Feed the MXU bf16 operands, accumulate in f32.
    return jnp.dot(a.astype(jnp.bfloat16), b.astype(jnp.bfloat16),
                   preferred_element_type=jnp.float32)


def _pick_tile_m(m, pref=256):
    """Largest multiple-of-8 divisor of m (<= pref); prefer a choice giving >=2
    grid steps so the 'parallel' axis can use v7x's second TensorCore."""
    best_any = None
    best_par = None
    d = 8
    while d <= min(pref, m):
        if m % d == 0:
            best_any = d
            if m // d >= 2:
                best_par = d
        d += 8
    if best_par is not None:
        return best_par
    if best_any is not None:
        return best_any
    return m  # single full-size block (block_shape == array dim is always legal)


def _pick_tile_k(k, pref=512):
    """Tile for the FFN intermediate axis: a multiple of 128 dividing k, else k."""
    if k <= pref:
        return k
    if k % pref == 0:
        return pref
    d = (pref // 128) * 128
    while d >= 128:
        if k % d == 0:
            return d
        d -= 128
    return k


# --------------------------------------------------------------------------
# Pallas kernels
# --------------------------------------------------------------------------
def _ln_kernel(x_ref, g_ref, b_ref, o_ref, *, eps):
    x = x_ref[...].astype(jnp.float32)
    o_ref[...] = _layer_norm(x, g_ref[...], b_ref[...], eps).astype(o_ref.dtype)


def _attn_block_kernel(x_ref, m_ref, wqkv_ref, bqkv_ref, wo_ref, bo_ref,
                       g_ref, b_ref, o_ref, ctx_ref,
                       *, nheads, head_dim, scale, eps):
    # Fused: QKV projection + multi-head self-attention + output projection
    # + residual-add + LayerNorm1, for one batch element.
    hidden = nheads * head_dim
    xb = x_ref[0]                               # (S, H) bf16
    res = xb.astype(jnp.float32)                # residual branch in f32
    mask = m_ref[0]                             # (1, S) additive mask over keys

    # One wide (S,H)@(H,3H) MXU matmul for Q,K,V (activation never hits HBM).
    qkv = _mxu_dot(xb, wqkv_ref[...]) + bqkv_ref[...]           # (S, 3H) f32

    # Per-head attention; each head's context lands in a lane slice of a
    # (S, HIDDEN) f32 VMEM scratch, so the output projection below is a single
    # (S,H)@(H,H) matmul (no per-head partial out-proj / VALU accumulation).
    q0, k0, v0 = 0, hidden, 2 * hidden
    for h in range(nheads):
        lo, hi = h * head_dim, (h + 1) * head_dim
        q_h = qkv[:, q0 + lo:q0 + hi].astype(jnp.bfloat16)
        k_h = qkv[:, k0 + lo:k0 + hi].astype(jnp.bfloat16)
        v_h = qkv[:, v0 + lo:v0 + hi].astype(jnp.bfloat16)
        s = jax.lax.dot_general(q_h, k_h, (((1,), (1,)), ((), ())),
                                preferred_element_type=jnp.float32)   # (S, S)
        s = s * scale + mask
        s = s - jnp.max(s, axis=-1, keepdims=True)
        p = jnp.exp(s)
        p = p / jnp.sum(p, axis=-1, keepdims=True)                    # exact recip
        ctx_ref[:, lo:hi] = jnp.dot(p.astype(jnp.bfloat16), v_h,
                                    preferred_element_type=jnp.float32)

    y = _mxu_dot(ctx_ref[...], wo_ref[...]) + bo_ref[...] + res
    o_ref[0] = _layer_norm(y, g_ref[...], b_ref[...], eps).astype(o_ref.dtype)


def _ffn_kernel(x_ref, w1_ref, b1_ref, w2_ref, b2_ref, g_ref, b_ref, o_ref,
                acc_ref, *, eps):
    # Fused: dense -> GELU -> dense (tiled over INTERMEDIATE) -> residual -> LN2.
    # The (tm, tI) intermediate activation lives only in VMEM/vregs.
    it = pl.program_id(1)

    @pl.when(it == 0)
    def _():
        acc_ref[...] = jnp.zeros_like(acc_ref)

    x = x_ref[...]                                        # (tm, H) bf16, resident
    h = _gelu(_mxu_dot(x, w1_ref[...]) + b1_ref[...])     # (tm, tI) f32
    acc_ref[...] += _mxu_dot(h, w2_ref[...])              # accumulate over I tiles

    @pl.when(it == pl.num_programs(1) - 1)
    def _():
        y = acc_ref[...] + b2_ref[...] + x.astype(jnp.float32)
        o_ref[...] = _layer_norm(y, g_ref[...], b_ref[...], eps).astype(o_ref.dtype)


# --------------------------------------------------------------------------
# Pallas wrappers
# --------------------------------------------------------------------------
def layer_norm(x2d, gamma, beta, tm=256):
    M, H = x2d.shape
    tm = _pick_tile_m(M, tm)
    return pl.pallas_call(
        functools.partial(_ln_kernel, eps=LN_EPS),
        out_shape=jax.ShapeDtypeStruct((M, H), jnp.bfloat16),
        grid=(M // tm,),
        in_specs=[
            pl.BlockSpec((tm, H), lambda i: (i, 0)),
            pl.BlockSpec((1, H), lambda i: (0, 0)),
            pl.BlockSpec((1, H), lambda i: (0, 0)),
        ],
        out_specs=pl.BlockSpec((tm, H), lambda i: (i, 0)),
        compiler_params=pltpu.CompilerParams(
            dimension_semantics=("parallel",),
            vmem_limit_bytes=VMEM_LIMIT,
        ),
    )(x2d, gamma, beta)


def attn_block(x3, ext_mask, wqkv, bqkv, wo, bo, ln_g, ln_b):
    # x3: (B, S, H) bf16; ext_mask: (B, 1, S) additive f32 mask.
    B, S, H = x3.shape
    H3 = wqkv.shape[1]
    kernel = functools.partial(
        _attn_block_kernel, nheads=NHEADS, head_dim=HEAD_DIM,
        scale=1.0 / math.sqrt(HEAD_DIM), eps=LN_EPS)
    return pl.pallas_call(
        kernel,
        out_shape=jax.ShapeDtypeStruct((B, S, H), jnp.bfloat16),
        grid=(B,),
        in_specs=[
            pl.BlockSpec((1, S, H), lambda i: (i, 0, 0)),
            pl.BlockSpec((1, 1, S), lambda i: (i, 0, 0)),
            pl.BlockSpec((H, H3), lambda i: (0, 0)),      # Wqkv resident across steps
            pl.BlockSpec((1, H3), lambda i: (0, 0)),
            pl.BlockSpec((H, H), lambda i: (0, 0)),       # Wo resident across steps
            pl.BlockSpec((1, H), lambda i: (0, 0)),
            pl.BlockSpec((1, H), lambda i: (0, 0)),
            pl.BlockSpec((1, H), lambda i: (0, 0)),
        ],
        out_specs=pl.BlockSpec((1, S, H), lambda i: (i, 0, 0)),
        scratch_shapes=[pltpu.VMEM((S, H), jnp.float32)],
        compiler_params=pltpu.CompilerParams(
            dimension_semantics=("parallel",),
            vmem_limit_bytes=VMEM_LIMIT,
        ),
    )(x3, ext_mask, wqkv, bqkv, wo, bo, ln_g, ln_b)


def ffn_block(x2d, w1, b1, w2, b2, ln_g, ln_b, tm=256, ti=512):
    M, H = x2d.shape
    I = w1.shape[1]
    tm = _pick_tile_m(M, tm)
    ti = _pick_tile_k(I, ti)
    return pl.pallas_call(
        functools.partial(_ffn_kernel, eps=LN_EPS),
        out_shape=jax.ShapeDtypeStruct((M, H), jnp.bfloat16),
        grid=(M // tm, I // ti),
        in_specs=[
            pl.BlockSpec((tm, H), lambda i, k: (i, 0)),   # x resident over I tiles
            pl.BlockSpec((H, ti), lambda i, k: (0, k)),
            pl.BlockSpec((1, ti), lambda i, k: (0, k)),
            pl.BlockSpec((ti, H), lambda i, k: (k, 0)),
            pl.BlockSpec((1, H), lambda i, k: (0, 0)),
            pl.BlockSpec((1, H), lambda i, k: (0, 0)),
            pl.BlockSpec((1, H), lambda i, k: (0, 0)),
        ],
        out_specs=pl.BlockSpec((tm, H), lambda i, k: (i, 0)),
        scratch_shapes=[pltpu.VMEM((tm, H), jnp.float32)],
        compiler_params=pltpu.CompilerParams(
            dimension_semantics=("parallel", "arbitrary"),
            vmem_limit_bytes=VMEM_LIMIT,
        ),
    )(x2d, w1, b1, w2, b2, ln_g, ln_b)


# --------------------------------------------------------------------------
# Model (glue in plain JAX; hot paths in the fused Pallas kernels above)
# --------------------------------------------------------------------------
def init_params(key):
    def nrm(k, shape, scale=0.02, dtype=jnp.bfloat16):
        return (scale * jax.random.normal(k, shape)).astype(dtype)

    keys = iter(jax.random.split(key, 8 + NLAYERS * 8))
    p = {
        "word_emb": nrm(next(keys), (VOCAB, HIDDEN), dtype=jnp.float32),
        "pos_emb": nrm(next(keys), (MAX_POS, HIDDEN), dtype=jnp.float32),
        "type_emb": nrm(next(keys), (NTYPES, HIDDEN), dtype=jnp.float32),
        "emb_ln_g": jnp.ones((1, HIDDEN), jnp.float32),
        "emb_ln_b": jnp.zeros((1, HIDDEN), jnp.float32),
        "layers": [],
        "pooler_w": nrm(next(keys), (HIDDEN, HIDDEN)),                # bf16
        "pooler_b": jnp.zeros((HIDDEN,), jnp.float32),
        # classifier: torch.nn.init.xavier_normal_ -> std = sqrt(2/(fan_in+fan_out))
        "cls_w": (math.sqrt(2.0 / (HIDDEN + NUM_LABELS))
                  * jax.random.normal(next(keys), (HIDDEN, NUM_LABELS))
                  ).astype(jnp.bfloat16),
        "cls_b": jnp.zeros((NUM_LABELS,), jnp.float32),
    }
    for _ in range(NLAYERS):
        wq = nrm(next(keys), (HIDDEN, HIDDEN), dtype=jnp.float32)
        wk = nrm(next(keys), (HIDDEN, HIDDEN), dtype=jnp.float32)
        wv = nrm(next(keys), (HIDDEN, HIDDEN), dtype=jnp.float32)
        lp = {
            # fused QKV projection weight / bias (bf16 weights, f32 biases)
            "wqkv": jnp.concatenate([wq, wk, wv], axis=1).astype(jnp.bfloat16),
            "bqkv": jnp.zeros((1, 3 * HIDDEN), jnp.float32),
            "wo": nrm(next(keys), (HIDDEN, HIDDEN)),
            "bo": jnp.zeros((1, HIDDEN), jnp.float32),
            "ln1_g": jnp.ones((1, HIDDEN), jnp.float32),
            "ln1_b": jnp.zeros((1, HIDDEN), jnp.float32),
            "w1": nrm(next(keys), (HIDDEN, INTERMEDIATE)),
            "b1": jnp.zeros((1, INTERMEDIATE), jnp.float32),
            "w2": nrm(next(keys), (INTERMEDIATE, HIDDEN)),
            "b2": jnp.zeros((1, HIDDEN), jnp.float32),
            "ln2_g": jnp.ones((1, HIDDEN), jnp.float32),
            "ln2_b": jnp.zeros((1, HIDDEN), jnp.float32),
        }
        p["layers"].append(lp)
    return p


def encoder_layer(lp, x2, ext_mask, B, S):
    # fused QKV proj + attention + out-proj + residual + LayerNorm1 (one kernel)
    x3 = attn_block(x2.reshape(B, S, HIDDEN), ext_mask,
                    lp["wqkv"], lp["bqkv"], lp["wo"], lp["bo"],
                    lp["ln1_g"], lp["ln1_b"])
    x2 = x3.reshape(B * S, HIDDEN)
    # fused feed-forward + residual + LayerNorm2 (intermediate tiled, kept in VMEM)
    x2 = ffn_block(x2, lp["w1"], lp["b1"], lp["w2"], lp["b2"],
                   lp["ln2_g"], lp["ln2_b"])
    return x2


def bert_classifier_forward(params, input_ids, token_type_ids=None, attention_mask=None):
    B, S = input_ids.shape
    if token_type_ids is None:
        token_type_ids = jnp.zeros((B, S), jnp.int32)
    if attention_mask is None:
        attention_mask = jnp.ones((B, S), jnp.int32)

    # embeddings (gather is glue) + LayerNorm (Pallas kernel; emits bf16 states)
    pos_ids = jnp.arange(S)[None, :]
    emb = (params["word_emb"][input_ids]
           + params["pos_emb"][pos_ids]
           + params["type_emb"][token_type_ids])                   # (B, S, H) f32
    x2 = layer_norm(emb.reshape(B * S, HIDDEN).astype(jnp.float32),
                    params["emb_ln_g"], params["emb_ln_b"])        # -> bf16
    # embedding dropout: identity (eval)

    ext_mask = ((1.0 - attention_mask.astype(jnp.float32)) * -10000.0).reshape(B, 1, S)

    for lp in params["layers"]:
        x2 = encoder_layer(lp, x2, ext_mask, B, S)

    # pooler (first token -> dense + tanh) + classifier: tiny (B,H) matmuls,
    # done in plain JAX per review (launch/DMA setup would exceed the compute).
    seq = x2.reshape(B, S, HIDDEN).astype(jnp.float32)
    cls_tok = seq[:, 0, :]
    pooled = jnp.tanh(cls_tok @ params["pooler_w"].astype(jnp.float32)
                      + params["pooler_b"])
    # classifier dropout: identity (eval)
    logits = pooled @ params["cls_w"].astype(jnp.float32) + params["cls_b"]
    return logits


if __name__ == "__main__":
    key = jax.random.PRNGKey(0)
    k_param, k_ids = jax.random.split(key)

    B, S = 2, 8
    input_ids = jax.random.randint(k_ids, (B, S), 0, VOCAB, dtype=jnp.int32)
    token_type_ids = jnp.zeros((B, S), jnp.int32)
    attention_mask = jnp.ones((B, S), jnp.int32)

    params = init_params(k_param)
    logits = jax.jit(bert_classifier_forward)(params, input_ids, token_type_ids, attention_mask)
    jax.block_until_ready(logits)
    assert logits.shape == (B, NUM_LABELS)
    assert bool(jnp.all(jnp.isfinite(logits)))
    print("KERNEL_OK")
</pallas_src>

<mosaic_0001>
module attributes {stable_mosaic.version = 11 : i64} {
  func.func @_ln_kernel(%arg0: i32, %arg1: memref<8x32xf32, #tpu.memory_space<vmem>>, %arg2: memref<1x32xf32, #tpu.memory_space<vmem>>, %arg3: memref<1x32xf32, #tpu.memory_space<vmem>>, %arg4: memref<8x32xbf16, #tpu.memory_space<vmem>>) attributes {dimension_semantics = [#tpu.dimension_semantics<parallel>], iteration_bounds = array<i64: 2>, scalar_prefetch = 0 : i64, scratch_operands = 0 : i64, tpu.core_type = #tpu.core_type<tc>, window_params = [{transform_indices = @transform_0, window_bounds = array<i64: 8, 32>}, {pipeline_mode = #tpu.pipeline_mode<synchronous>, transform_indices = @transform_1, window_bounds = array<i64: 1, 32>}, {pipeline_mode = #tpu.pipeline_mode<synchronous>, transform_indices = @transform_2, window_bounds = array<i64: 1, 32>}, {transform_indices = @transform_3, window_bounds = array<i64: 8, 32>}]} {
    %c0 = arith.constant 0 : index
    %c0_0 = arith.constant 0 : index
    %0 = vector.load %arg1[%c0, %c0_0] : memref<8x32xf32, #tpu.memory_space<vmem>>, vector<8x32xf32>
    %c0_1 = arith.constant 0 : index
    %c0_2 = arith.constant 0 : index
    %1 = vector.load %arg2[%c0_1, %c0_2] : memref<1x32xf32, #tpu.memory_space<vmem>>, vector<1x32xf32>
    %c0_3 = arith.constant 0 : index
    %c0_4 = arith.constant 0 : index
    %2 = vector.load %arg3[%c0_3, %c0_4] : memref<1x32xf32, #tpu.memory_space<vmem>>, vector<1x32xf32>
    %cst = arith.constant dense<0.000000e+00> : vector<8xf32>
    %3 = vector.multi_reduction <add>, %0, %cst [1] : vector<8x32xf32> to vector<8xf32>
    %4 = vector.shape_cast %3 : vector<8xf32> to vector<8x1xf32>
    %cst_5 = arith.constant 3.200000e+01 : f32
    %5 = vector.broadcast %cst_5 : f32 to vector<8x1xf32>
    %6 = arith.divf %4, %5 : vector<8x1xf32>
    %7 = vector.broadcast %6 : vector<8x1xf32> to vector<8x32xf32>
    %8 = arith.subf %0, %7 : vector<8x32xf32>
    %9 = arith.mulf %8, %8 : vector<8x32xf32>
    %cst_6 = arith.constant dense<0.000000e+00> : vector<8xf32>
    %10 = vector.multi_reduction <add>, %9, %cst_6 [1] : vector<8x32xf32> to vector<8xf32>
    %11 = vector.shape_cast %10 : vector<8xf32> to vector<8x1xf32>
    %cst_7 = arith.constant 3.200000e+01 : f32
    %12 = vector.broadcast %cst_7 : f32 to vector<8x1xf32>
    %13 = arith.divf %11, %12 : vector<8x1xf32>
    %14 = vector.broadcast %6 : vector<8x1xf32> to vector<8x32xf32>
    %15 = arith.subf %0, %14 : vector<8x32xf32>
    %cst_8 = arith.constant 9.99999996E-13 : f32
    %16 = vector.broadcast %cst_8 : f32 to vector<8x1xf32>
    %17 = arith.addf %13, %16 : vector<8x1xf32>
    %18 = math.rsqrt %17 : vector<8x1xf32>
    %19 = vector.broadcast %18 : vector<8x1xf32> to vector<8x32xf32>
    %20 = arith.mulf %15, %19 : vector<8x32xf32>
    %21 = vector.broadcast %1 : vector<1x32xf32> to vector<8x32xf32>
    %22 = arith.mulf %20, %21 : vector<8x32xf32>
    %23 = vector.broadcast %2 : vector<1x32xf32> to vector<8x32xf32>
    %24 = arith.addf %22, %23 : vector<8x32xf32>
    %25 = arith.truncf %24 : vector<8x32xf32> to vector<8x32xbf16>
    %c0_9 = arith.constant 0 : index
    %c0_10 = arith.constant 0 : index
    %26 = vector.load %arg4[%c0_9, %c0_10] : memref<8x32xbf16, #tpu.memory_space<vmem>>, vector<8x32xbf16>
    tpu.vector_store %arg4[%c0_9, %c0_10], %25 {strides = array<i32>} : memref<8x32xbf16, #tpu.memory_space<vmem>>, vector<8x32xbf16>,
    return
  }
  func.func @transform_0(%arg0: i32) -> (i32, i32) {
    %c0_i32 = arith.constant 0 : i32
    %c0_i32_0 = arith.constant 0 : i32
    return %arg0, %c0_i32 : i32, i32
  }
  func.func @transform_1(%arg0: i32) -> (i32, i32) {
    %c0_i32 = arith.constant 0 : i32
    %c0_i32_0 = arith.constant 0 : i32
    %c0_i32_1 = arith.constant 0 : i32
    return %c0_i32, %c0_i32_0 : i32, i32
  }
  func.func @transform_2(%arg0: i32) -> (i32, i32) {
    %c0_i32 = arith.constant 0 : i32
    %c0_i32_0 = arith.constant 0 : i32
    %c0_i32_1 = arith.constant 0 : i32
    return %c0_i32, %c0_i32_0 : i32, i32
  }
  func.func @transform_3(%arg0: i32) -> (i32, i32) {
    %c0_i32 = arith.constant 0 : i32
    %c0_i32_0 = arith.constant 0 : i32
    return %arg0, %c0_i32 : i32, i32
  }
}

module attributes {stable_mosaic.version = 11 : i64} {
  func.func @_ffn_kernel(%arg0: i32, %arg1: i32, %arg2: memref<8x32xbf16, #tpu.memory_space<vmem>>, %arg3: memref<32x64xbf16, #tpu.memory_space<vmem>>, %arg4: memref<1x64xf32, #tpu.memory_space<vmem>>, %arg5: memref<64x32xbf16, #tpu.memory_space<vmem>>, %arg6: memref<1x32xf32, #tpu.memory_space<vmem>>, %arg7: memref<1x32xf32, #tpu.memory_space<vmem>>, %arg8: memref<1x32xf32, #tpu.memory_space<vmem>>, %arg9: memref<8x32xbf16, #tpu.memory_space<vmem>>, %arg10: memref<8x32xf32, #tpu.memory_space<vmem>>) attributes {dimension_semantics = [#tpu.dimension_semantics<parallel>, #tpu.dimension_semantics<arbitrary>], iteration_bounds = array<i64: 2, 1>, scalar_prefetch = 0 : i64, scratch_operands = 1 : i64, tpu.core_type = #tpu.core_type<tc>, window_params = [{transform_indices = @transform_0, window_bounds = array<i64: 8, 32>}, {transform_indices = @transform_1, window_bounds = array<i64: 32, 64>}, {transform_indices = @transform_2, window_bounds = array<i64: 1, 64>}, {transform_indices = @transform_3, window_bounds = array<i64: 64, 32>}, {pipeline_mode = #tpu.pipeline_mode<synchronous>, transform_indices = @transform_4, window_bounds = array<i64: 1, 32>}, {pipeline_mode = #tpu.pipeline_mode<synchronous>, transform_indices = @transform_5, window_bounds = array<i64: 1, 32>}, {pipeline_mode = #tpu.pipeline_mode<synchronous>, transform_indices = @transform_6, window_bounds = array<i64: 1, 32>}, {transform_indices = @transform_7, window_bounds = array<i64: 8, 32>}]} {
    %c0_i32 = arith.constant 0 : i32
    %0 = arith.cmpi eq, %arg1, %c0_i32 : i32
    %1 = arith.extui %0 : i1 to i32
    %c0_i32_0 = arith.constant 0 : i32
    %2 = arith.cmpi ne, %1, %c0_i32_0 : i32
    scf.if %2 {
      %cst_19 = arith.constant 0.000000e+00 : f32
      %31 = vector.broadcast %cst_19 : f32 to vector<8x32xf32>
      %c0_20 = arith.constant 0 : index
      %c0_21 = arith.constant 0 : index
      %32 = vector.load %arg10[%c0_20, %c0_21] : memref<8x32xf32, #tpu.memory_space<vmem>>, vector<8x32xf32>
      tpu.vector_store %arg10[%c0_20, %c0_21], %31 {strides = array<i32>} : memref<8x32xf32, #tpu.memory_space<vmem>>, vector<8x32xf32>,
    } else {
    }
    %c0 = arith.constant 0 : index
    %c0_1 = arith.constant 0 : index
    %3 = vector.load %arg2[%c0, %c0_1] : memref<8x32xbf16, #tpu.memory_space<vmem>>, vector<8x32xbf16>
    %c0_2 = arith.constant 0 : index
    %c0_3 = arith.constant 0 : index
    %4 = vector.load %arg3[%c0_2, %c0_3] : memref<32x64xbf16, #tpu.memory_space<vmem>>, vector<32x64xbf16>
    %cst = arith.constant dense<0.000000e+00> : vector<8x64xf32>
    %5 = tpu.matmul %3, %4, %cst {dimension_numbers = #tpu.dot_dimension_numbers<[1], [0], [0], [1], [0, 0, 1, 1], [], []>} : vector<8x32xbf16>, vector<32x64xbf16>, vector<8x64xf32> -> vector<8x64xf32>
    %c0_4 = arith.constant 0 : index
    %c0_5 = arith.constant 0 : index
    %6 = vector.load %arg4[%c0_4, %c0_5] : memref<1x64xf32, #tpu.memory_space<vmem>>, vector<1x64xf32>
    %7 = vector.broadcast %6 : vector<1x64xf32> to vector<8x64xf32>
    %8 = arith.addf %5, %7 : vector<8x64xf32>
    %cst_6 = arith.constant 5.000000e-01 : f32
    %9 = vector.broadcast %cst_6 : f32 to vector<8x64xf32>
    %10 = arith.mulf %9, %8 : vector<8x64xf32>
    %cst_7 = arith.constant 4.471500e-02 : f32
    %11 = vector.broadcast %cst_7 : f32 to vector<8x64xf32>
    %12 = arith.mulf %11, %8 : vector<8x64xf32>
    %13 = arith.mulf %12, %8 : vector<8x64xf32>
    %14 = arith.mulf %13, %8 : vector<8x64xf32>
    %15 = arith.addf %8, %14 : vector<8x64xf32>
    %cst_8 = arith.constant 0.797884583 : f32
    %16 = vector.broadcast %cst_8 : f32 to vector<8x64xf32>
    %17 = arith.mulf %16, %15 : vector<8x64xf32>
    %18 = math.tanh %17 : vector<8x64xf32>
    %cst_9 = arith.constant 1.000000e+00 : f32
    %19 = vector.broadcast %cst_9 : f32 to vector<8x64xf32>
    %20 = arith.addf %19, %18 : vector<8x64xf32>
    %21 = arith.mulf %10, %20 : vector<8x64xf32>
    %c0_10 = arith.constant 0 : index
    %c0_11 = arith.constant 0 : index
    %22 = vector.load %arg10[%c0_10, %c0_11] : memref<8x32xf32, #tpu.memory_space<vmem>>, vector<8x32xf32>
    %c0_12 = arith.constant 0 : index
    %c0_13 = arith.constant 0 : index
    %23 = vector.load %arg5[%c0_12, %c0_13] : memref<64x32xbf16, #tpu.memory_space<vmem>>, vector<64x32xbf16>
    %24 = arith.truncf %21 : vector<8x64xf32> to vector<8x64xbf16>
    %cst_14 = arith.constant dense<0.000000e+00> : vector<8x32xf32>
    %25 = tpu.matmul %24, %23, %cst_14 {dimension_numbers = #tpu.dot_dimension_numbers<[1], [0], [0], [1], [0, 0, 1, 1], [], []>} : vector<8x64xbf16>, vector<64x32xbf16>, vector<8x32xf32> -> vector<8x32xf32>
    %26 = arith.addf %22, %25 : vector<8x32xf32>
    %c0_15 = arith.constant 0 : index
    %c0_16 = arith.constant 0 : index
    %27 = vector.load %arg10[%c0_15, %c0_16] : memref<8x32xf32, #tpu.memory_space<vmem>>, vector<8x32xf32>
    tpu.vector_store %arg10[%c0_15, %c0_16], %26 {strides = array<i32>} : memref<8x32xf32, #tpu.memory_space<vmem>>, vector<8x32xf32>,
    %c0_i32_17 = arith.constant 0 : i32
    %28 = arith.cmpi eq, %arg1, %c0_i32_17 : i32
    %29 = arith.extui %28 : i1 to i32
    %c0_i32_18 = arith.constant 0 : i32
    %30 = arith.cmpi ne, %29, %c0_i32_18 : i32
    scf.if %30 {
      %c0_19 = arith.constant 0 : index
      %c0_20 = arith.constant 0 : index
      %31 = vector.load %arg10[%c0_19, %c0_20] : memref<8x32xf32, #tpu.memory_space<vmem>>, vector<8x32xf32>
      %c0_21 = arith.constant 0 : index
      %c0_22 = arith.constant 0 : index
      %32 = vector.load %arg6[%c0_21, %c0_22] : memref<1x32xf32, #tpu.memory_space<vmem>>, vector<1x32xf32>
      %33 = vector.broadcast %32 : vector<1x32xf32> to vector<8x32xf32>
      %34 = arith.addf %31, %33 : vector<8x32xf32>
      %35 = arith.extf %3 : vector<8x32xbf16> to vector<8x32xf32>
      %36 = arith.addf %34, %35 : vector<8x32xf32>
      %c0_23 = arith.constant 0 : index
      %c0_24 = arith.constant 0 : index
      %37 = vector.load %arg7[%c0_23, %c0_24] : memref<1x32xf32, #tpu.memory_space<vmem>>, vector<1x32xf32>
      %c0_25 = arith.constant 0 : index
      %c0_26 = arith.constant 0 : index
      %38 = vector.load %arg8[%c0_25, %c0_26] : memref<1x32xf32, #tpu.memory_space<vmem>>, vector<1x32xf32>
      %cst_27 = arith.constant dense<0.000000e+00> : vector<8xf32>
      %39 = vector.multi_reduction <add>, %36, %cst_27 [1] : vector<8x32xf32> to vector<8xf32>
      %40 = vector.shape_cast %39 : vector<8xf32> to vector<8x1xf32>
      %cst_28 = arith.constant 3.200000e+01 : f32
      %41 = vector.broadcast %cst_28 : f32 to vector<8x1xf32>
      %42 = arith.divf %40, %41 : vector<8x1xf32>
      %43 = vector.broadcast %42 : vector<8x1xf32> to vector<8x32xf32>
      %44 = arith.subf %36, %43 : vector<8x32xf32>
      %45 = arith.mulf %44, %44 : vector<8x32xf32>
      %cst_29 = arith.constant dense<0.000000e+00> : vector<8xf32>
      %46 = vector.multi_reduction <add>, %45, %cst_29 [1] : vector<8x32xf32> to vector<8xf32>
      %47 = vector.shape_cast %46 : vector<8xf32> to vector<8x1xf32>
      %cst_30 = arith.constant 3.200000e+01 : f32
      %48 = vector.broadcast %cst_30 : f32 to vector<8x1xf32>
      %49 = arith.divf %47, %48 : vector<8x1xf32>
      %50 = vector.broadcast %42 : vector<8x1xf32> to vector<8x32xf32>
      %51 = arith.subf %36, %50 : vector<8x32xf32>
      %cst_31 = arith.constant 9.99999996E-13 : f32
      %52 = vector.broadcast %cst_31 : f32 to vector<8x1xf32>
      %53 = arith.addf %49, %52 : vector<8x1xf32>
      %54 = math.rsqrt %53 : vector<8x1xf32>
      %55 = vector.broadcast %54 : vector<8x1xf32> to vector<8x32xf32>
      %56 = arith.mulf %51, %55 : vector<8x32xf32>
      %57 = vector.broadcast %37 : vector<1x32xf32> to vector<8x32xf32>
      %58 = arith.mulf %56, %57 : vector<8x32xf32>
      %59 = vector.broadcast %38 : vector<1x32xf32> to vector<8x32xf32>
      %60 = arith.addf %58, %59 : vector<8x32xf32>
      %61 = arith.truncf %60 : vector<8x32xf32> to vector<8x32xbf16>
      %c0_32 = arith.constant 0 : index
      %c0_33 = arith.constant 0 : index
      %62 = vector.load %arg9[%c0_32, %c0_33] : memref<8x32xbf16, #tpu.memory_space<vmem>>, vector<8x32xbf16>
      tpu.vector_store %arg9[%c0_32, %c0_33], %61 {strides = array<i32>} : memref<8x32xbf16, #tpu.memory_space<vmem>>, vector<8x32xbf16>,
    } else {
    }
    return
  }
  func.func @transform_0(%arg0: i32, %arg1: i32) -> (i32, i32) {
    %c0_i32 = arith.constant 0 : i32
    %c0_i32_0 = arith.constant 0 : i32
    return %arg0, %c0_i32 : i32, i32
  }
  func.func @transform_1(%arg0: i32, %arg1: i32) -> (i32, i32) {
    %c0_i32 = arith.constant 0 : i32
    %c0_i32_0 = arith.constant 0 : i32
    return %c0_i32, %arg1 : i32, i32
  }
  func.func @transform_2(%arg0: i32, %arg1: i32) -> (i32, i32) {
    %c0_i32 = arith.constant 0 : i32
    %c0_i32_0 = arith.constant 0 : i32
    return %c0_i32, %arg1 : i32, i32
  }
  func.func @transform_3(%arg0: i32, %arg1: i32) -> (i32, i32) {
    %c0_i32 = arith.constant 0 : i32
    %c0_i32_0 = arith.constant 0 : i32
    return %arg1, %c0_i32 : i32, i32
  }
  func.func @transform_4(%arg0: i32, %arg1: i32) -> (i32, i32) {
    %c0_i32 = arith.constant 0 : i32
    %c0_i32_0 = arith.constant 0 : i32
    %c0_i32_1 = arith.constant 0 : i32
    return %c0_i32, %c0_i32_0 : i32, i32
  }
  func.func @transform_5(%arg0: i32, %arg1: i32) -> (i32, i32) {
    %c0_i32 = arith.constant 0 : i32
    %c0_i32_0 = arith.constant 0 : i32
    %c0_i32_1 = arith.constant 0 : i32
    return %c0_i32, %c0_i32_0 : i32, i32
  }
  func.func @transform_6(%arg0: i32, %arg1: i32) -> (i32, i32) {
    %c0_i32 = arith.constant 0 : i32
    %c0_i32_0 = arith.constant 0 : i32
    %c0_i32_1 = arith.constant 0 : i32
    return %c0_i32, %c0_i32_0 : i32, i32
  }
  func.func @transform_7(%arg0: i32, %arg1: i32) -> (i32, i32) {
    %c0_i32 = arith.constant 0 : i32
    %c0_i32_0 = arith.constant 0 : i32
    return %arg0, %c0_i32 : i32, i32
  }
}

module attributes {stable_mosaic.version = 11 : i64} {
  func.func @_attn_block_kernel(%arg0: i32, %arg1: memref<1x8x32xbf16, #tpu.memory_space<vmem>>, %arg2: memref<1x1x8xf32, #tpu.memory_space<vmem>>, %arg3: memref<32x96xbf16, #tpu.memory_space<vmem>>, %arg4: memref<1x96xf32, #tpu.memory_space<vmem>>, %arg5: memref<32x32xbf16, #tpu.memory_space<vmem>>, %arg6: memref<1x32xf32, #tpu.memory_space<vmem>>, %arg7: memref<1x32xf32, #tpu.memory_space<vmem>>, %arg8: memref<1x32xf32, #tpu.memory_space<vmem>>, %arg9: memref<1x8x32xbf16, #tpu.memory_space<vmem>>, %arg10: memref<8x32xf32, #tpu.memory_space<vmem>>) attributes {dimension_semantics = [#tpu.dimension_semantics<parallel>], iteration_bounds = array<i64: 2>, scalar_prefetch = 0 : i64, scratch_operands = 1 : i64, tpu.core_type = #tpu.core_type<tc>, window_params = [{transform_indices = @transform_0, window_bounds = array<i64: 1, 8, 32>}, {transform_indices = @transform_1, window_bounds = array<i64: 1, 1, 8>}, {pipeline_mode = #tpu.pipeline_mode<synchronous>, transform_indices = @transform_2, window_bounds = array<i64: 32, 96>}, {pipeline_mode = #tpu.pipeline_mode<synchronous>, transform_indices = @transform_3, window_bounds = array<i64: 1, 96>}, {pipeline_mode = #tpu.pipeline_mode<synchronous>, transform_indices = @transform_4, window_bounds = array<i64: 32, 32>}, {pipeline_mode = #tpu.pipeline_mode<synchronous>, transform_indices = @transform_5, window_bounds = array<i64: 1, 32>}, {pipeline_mode = #tpu.pipeline_mode<synchronous>, transform_indices = @transform_6, window_bounds = array<i64: 1, 32>}, {pipeline_mode = #tpu.pipeline_mode<synchronous>, transform_indices = @transform_7, window_bounds = array<i64: 1, 32>}, {transform_indices = @transform_8, window_bounds = array<i64: 1, 8, 32>}]} {
    %c0 = arith.constant 0 : index
    %c0_0 = arith.constant 0 : index
    %c0_1 = arith.constant 0 : index
    %0 = vector.load %arg1[%c0, %c0_0, %c0_1] : memref<1x8x32xbf16, #tpu.memory_space<vmem>>, vector<1x8x32xbf16>
    %1 = vector.shape_cast %0 : vector<1x8x32xbf16> to vector<8x32xbf16>
    %2 = arith.extf %1 : vector<8x32xbf16> to vector<8x32xf32>
    %c0_2 = arith.constant 0 : index
    %c0_3 = arith.constant 0 : index
    %c0_4 = arith.constant 0 : index
    %3 = vector.load %arg2[%c0_2, %c0_3, %c0_4] : memref<1x1x8xf32, #tpu.memory_space<vmem>>, vector<1x1x8xf32>
    %4 = vector.shape_cast %3 : vector<1x1x8xf32> to vector<1x8xf32>
    %c0_5 = arith.constant 0 : index
    %c0_6 = arith.constant 0 : index
    %5 = vector.load %arg3[%c0_5, %c0_6] : memref<32x96xbf16, #tpu.memory_space<vmem>>, vector<32x96xbf16>
    %cst = arith.constant dense<0.000000e+00> : vector<8x96xf32>
    %6 = tpu.matmul %1, %5, %cst {dimension_numbers = #tpu.dot_dimension_numbers<[1], [0], [0], [1], [0, 0, 1, 1], [], []>} : vector<8x32xbf16>, vector<32x96xbf16>, vector<8x96xf32> -> vector<8x96xf32>
    %c0_7 = arith.constant 0 : index
    %c0_8 = arith.constant 0 : index
    %7 = vector.load %arg4[%c0_7, %c0_8] : memref<1x96xf32, #tpu.memory_space<vmem>>, vector<1x96xf32>
    %8 = vector.broadcast %7 : vector<1x96xf32> to vector<8x96xf32>
    %9 = arith.addf %6, %8 : vector<8x96xf32>
    %10 = vector.extract_strided_slice %9 {offsets = [0, 0], sizes = [8, 8], strides = [1, 1]} : vector<8x96xf32> to vector<8x8xf32>
    %11 = arith.truncf %10 : vector<8x8xf32> to vector<8x8xbf16>
    %12 = vector.extract_strided_slice %9 {offsets = [0, 32], sizes = [8, 8], strides = [1, 1]} : vector<8x96xf32> to vector<8x8xf32>
    %13 = arith.truncf %12 : vector<8x8xf32> to vector<8x8xbf16>
    %14 = vector.extract_strided_slice %9 {offsets = [0, 64], sizes = [8, 8], strides = [1, 1]} : vector<8x96xf32> to vector<8x8xf32>
    %15 = arith.truncf %14 : vector<8x8xf32> to vector<8x8xbf16>
    %cst_9 = arith.constant dense<0.000000e+00> : vector<8x8xf32>
    %16 = tpu.matmul %11, %13, %cst_9 {dimension_numbers = #tpu.dot_dimension_numbers<[1], [1], [0], [0], [0, 0, 1, 0], [], []>} : vector<8x8xbf16>, vector<8x8xbf16>, vector<8x8xf32> -> vector<8x8xf32>
    %cst_10 = arith.constant 0.353553385 : f32
    %17 = vector.broadcast %cst_10 : f32 to vector<8x8xf32>
    %18 = arith.mulf %16, %17 : vector<8x8xf32>
    %19 = vector.broadcast %4 : vector<1x8xf32> to vector<8x8xf32>
    %20 = arith.addf %18, %19 : vector<8x8xf32>
    %cst_11 = arith.constant dense<0xFF800000> : vector<8xf32>
    %21 = vector.multi_reduction <maximumf>, %20, %cst_11 [1] : vector<8x8xf32> to vector<8xf32>
    %22 = vector.shape_cast %21 : vector<8xf32> to vector<8x1xf32>
    %23 = vector.broadcast %22 : vector<8x1xf32> to vector<8x8xf32>
    %24 = arith.subf %20, %23 : vector<8x8xf32>
    %25 = math.exp %24 : vector<8x8xf32>
    %cst_12 = arith.constant dense<0.000000e+00> : vector<8xf32>
    %26 = vector.multi_reduction <add>, %25, %cst_12 [1] : vector<8x8xf32> to vector<8xf32>
    %27 = vector.shape_cast %26 : vector<8xf32> to vector<8x1xf32>
    %28 = vector.broadcast %27 : vector<8x1xf32> to vector<8x8xf32>
    %29 = arith.divf %25, %28 : vector<8x8xf32>
    %30 = arith.truncf %29 : vector<8x8xf32> to vector<8x8xbf16>
    %cst_13 = arith.constant dense<0.000000e+00> : vector<8x8xf32>
    %31 = tpu.matmul %30, %15, %cst_13 {dimension_numbers = #tpu.dot_dimension_numbers<[1], [0], [0], [1], [0, 0, 1, 1], [], []>} : vector<8x8xbf16>, vector<8x8xbf16>, vector<8x8xf32> -> vector<8x8xf32>
    %c0_14 = arith.constant 0 : index
    %c0_15 = arith.constant 0 : index
    %32 = vector.load %arg10[%c0_14, %c0_15] : memref<8x32xf32, #tpu.memory_space<vmem>>, vector<8x8xf32>
    tpu.vector_store %arg10[%c0_14, %c0_15], %31 {strides = array<i32>} : memref<8x32xf32, #tpu.memory_space<vmem>>, vector<8x8xf32>,
    %33 = vector.extract_strided_slice %9 {offsets = [0, 8], sizes = [8, 8], strides = [1, 1]} : vector<8x96xf32> to vector<8x8xf32>
    %34 = arith.truncf %33 : vector<8x8xf32> to vector<8x8xbf16>
    %35 = vector.extract_strided_slice %9 {offsets = [0, 40], sizes = [8, 8], strides = [1, 1]} : vector<8x96xf32> to vector<8x8xf32>
    %36 = arith.truncf %35 : vector<8x8xf32> to vector<8x8xbf16>
    %37 = vector.extract_strided_slice %9 {offsets = [0, 72], sizes = [8, 8], strides = [1, 1]} : vector<8x96xf32> to vector<8x8xf32>
    %38 = arith.truncf %37 : vector<8x8xf32> to vector<8x8xbf16>
    %cst_16 = arith.constant dense<0.000000e+00> : vector<8x8xf32>
    %39 = tpu.matmul %34, %36, %cst_16 {dimension_numbers = #tpu.dot_dimension_numbers<[1], [1], [0], [0], [0, 0, 1, 0], [], []>} : vector<8x8xbf16>, vector<8x8xbf16>, vector<8x8xf32> -> vector<8x8xf32>
    %cst_17 = arith.constant 0.353553385 : f32
    %40 = vector.broadcast %cst_17 : f32 to vector<8x8xf32>
    %41 = arith.mulf %39, %40 : vector<8x8xf32>
    %42 = vector.broadcast %4 : vector<1x8xf32> to vector<8x8xf32>
    %43 = arith.addf %41, %42 : vector<8x8xf32>
    %cst_18 = arith.constant dense<0xFF800000> : vector<8xf32>
    %44 = vector.multi_reduction <maximumf>, %43, %cst_18 [1] : vector<8x8xf32> to vector<8xf32>
    %45 = vector.shape_cast %44 : vector<8xf32> to vector<8x1xf32>
    %46 = vector.broadcast %45 : vector<8x1xf32> to vector<8x8xf32>
    %47 = arith.subf %43, %46 : vector<8x8xf32>
    %48 = math.exp %47 : vector<8x8xf32>
    %cst_19 = arith.constant dense<0.000000e+00> : vector<8xf32>
    %49 = vector.multi_reduction <add>, %48, %cst_19 [1] : vector<8x8xf32> to vector<8xf32>
    %50 = vector.shape_cast %49 : vector<8xf32> to vector<8x1xf32>
    %51 = vector.broadcast %50 : vector<8x1xf32> to vector<8x8xf32>
    %52 = arith.divf %48, %51 : vector<8x8xf32>
    %53 = arith.truncf %52 : vector<8x8xf32> to vector<8x8xbf16>
    %cst_20 = arith.constant dense<0.000000e+00> : vector<8x8xf32>
    %54 = tpu.matmul %53, %38, %cst_20 {dimension_numbers = #tpu.dot_dimension_numbers<[1], [0], [0], [1], [0, 0, 1, 1], [], []>} : vector<8x8xbf16>, vector<8x8xbf16>, vector<8x8xf32> -> vector<8x8xf32>
    %c0_21 = arith.constant 0 : index
    %c8 = arith.constant 8 : index
    %55 = vector.load %arg10[%c0_21, %c8] : memref<8x32xf32, #tpu.memory_space<vmem>>, vector<8x8xf32>
    tpu.vector_store %arg10[%c0_21, %c8], %54 {strides = array<i32>} : memref<8x32xf32, #tpu.memory_space<vmem>>, vector<8x8xf32>,
    %56 = vector.extract_strided_slice %9 {offsets = [0, 16], sizes = [8, 8], strides = [1, 1]} : vector<8x96xf32> to vector<8x8xf32>
    %57 = arith.truncf %56 : vector<8x8xf32> to vector<8x8xbf16>
    %58 = vector.extract_strided_slice %9 {offsets = [0, 48], sizes = [8, 8], strides = [1, 1]} : vector<8x96xf32> to vector<8x8xf32>
    %59 = arith.truncf %58 : vector<8x8xf32> to vector<8x8xbf16>
    %60 = vector.extract_strided_slice %9 {offsets = [0, 80], sizes = [8, 8], strides = [1, 1]} : vector<8x96xf32> to vector<8x8xf32>
    %61 = arith.truncf %60 : vector<8x8xf32> to vector<8x8xbf16>
    %cst_22 = arith.constant dense<0.000000e+00> : vector<8x8xf32>
    %62 = tpu.matmul %57, %59, %cst_22 {dimension_numbers = #tpu.dot_dimension_numbers<[1], [1], [0], [0], [0, 0, 1, 0], [], []>} : vector<8x8xbf16>, vector<8x8xbf16>, vector<8x8xf32> -> vector<8x8xf32>
    %cst_23 = arith.constant 0.353553385 : f32
    %63 = vector.broadcast %cst_23 : f32 to vector<8x8xf32>
    %64 = arith.mulf %62, %63 : vector<8x8xf32>
    %65 = vector.broadcast %4 : vector<1x8xf32> to vector<8x8xf32>
    %66 = arith.addf %64, %65 : vector<8x8xf32>
    %cst_24 = arith.constant dense<0xFF800000> : vector<8xf32>
    %67 = vector.multi_reduction <maximumf>, %66, %cst_24 [1] : vector<8x8xf32> to vector<8xf32>
    %68 = vector.shape_cast %67 : vector<8xf32> to vector<8x1xf32>
    %69 = vector.broadcast %68 : vector<8x1xf32> to vector<8x8xf32>
    %70 = arith.subf %66, %69 : vector<8x8xf32>
    %71 = math.exp %70 : vector<8x8xf32>
    %cst_25 = arith.constant dense<0.000000e+00> : vector<8xf32>
    %72 = vector.multi_reduction <add>, %71, %cst_25 [1] : vector<8x8xf32> to vector<8xf32>
    %73 = vector.shape_cast %72 : vector<8xf32> to vector<8x1xf32>
    %74 = vector.broadcast %73 : vector<8x1xf32> to vector<8x8xf32>
    %75 = arith.divf %71, %74 : vector<8x8xf32>
    %76 = arith.truncf %75 : vector<8x8xf32> to vector<8x8xbf16>
    %cst_26 = arith.constant dense<0.000000e+00> : vector<8x8xf32>
    %77 = tpu.matmul %76, %61, %cst_26 {dimension_numbers = #tpu.dot_dimension_numbers<[1], [0], [0], [1], [0, 0, 1, 1], [], []>} : vector<8x8xbf16>, vector<8x8xbf16>, vector<8x8xf32> -> vector<8x8xf32>
    %c0_27 = arith.constant 0 : index
    %c16 = arith.constant 16 : index
    %78 = vector.load %arg10[%c0_27, %c16] : memref<8x32xf32, #tpu.memory_space<vmem>>, vector<8x8xf32>
    tpu.vector_store %arg10[%c0_27, %c16], %77 {strides = array<i32>} : memref<8x32xf32, #tpu.memory_space<vmem>>, vector<8x8xf32>,
    %79 = vector.extract_strided_slice %9 {offsets = [0, 24], sizes = [8, 8], strides = [1, 1]} : vector<8x96xf32> to vector<8x8xf32>
    %80 = arith.truncf %79 : vector<8x8xf32> to vector<8x8xbf16>
    %81 = vector.extract_strided_slice %9 {offsets = [0, 56], sizes = [8, 8], strides = [1, 1]} : vector<8x96xf32> to vector<8x8xf32>
    %82 = arith.truncf %81 : vector<8x8xf32> to vector<8x8xbf16>
    %83 = vector.extract_strided_slice %9 {offsets = [0, 88], sizes = [8, 8], strides = [1, 1]} : vector<8x96xf32> to vector<8x8xf32>
    %84 = arith.truncf %83 : vector<8x8xf32> to vector<8x8xbf16>
    %cst_28 = arith.constant dense<0.000000e+00> : vector<8x8xf32>
    %85 = tpu.matmul %80, %82, %cst_28 {dimension_numbers = #tpu.dot_dimension_numbers<[1], [1], [0], [0], [0, 0, 1, 0], [], []>} : vector<8x8xbf16>, vector<8x8xbf16>, vector<8x8xf32> -> vector<8x8xf32>
    %cst_29 = arith.constant 0.353553385 : f32
    %86 = vector.broadcast %cst_29 : f32 to vector<8x8xf32>
    %87 = arith.mulf %85, %86 : vector<8x8xf32>
    %88 = vector.broadcast %4 : vector<1x8xf32> to vector<8x8xf32>
    %89 = arith.addf %87, %88 : vector<8x8xf32>
    %cst_30 = arith.constant dense<0xFF800000> : vector<8xf32>
    %90 = vector.multi_reduction <maximumf>, %89, %cst_30 [1] : vector<8x8xf32> to vector<8xf32>
    %91 = vector.shape_cast %90 : vector<8xf32> to vector<8x1xf32>
    %92 = vector.broadcast %91 : vector<8x1xf32> to vector<8x8xf32>
    %93 = arith.subf %89, %92 : vector<8x8xf32>
    %94 = math.exp %93 : vector<8x8xf32>
    %cst_31 = arith.constant dense<0.000000e+00> : vector<8xf32>
    %95 = vector.multi_reduction <add>, %94, %cst_31 [1] : vector<8x8xf32> to vector<8xf32>
    %96 = vector.shape_cast %95 : vector<8xf32> to vector<8x1xf32>
    %97 = vector.broadcast %96 : vector<8x1xf32> to vector<8x8xf32>
    %98 = arith.divf %94, %97 : vector<8x8xf32>
    %99 = arith.truncf %98 : vector<8x8xf32> to vector<8x8xbf16>
    %cst_32 = arith.constant dense<0.000000e+00> : vector<8x8xf32>
    %100 = tpu.matmul %99, %84, %cst_32 {dimension_numbers = #tpu.dot_dimension_numbers<[1], [0], [0], [1], [0, 0, 1, 1], [], []>} : vector<8x8xbf16>, vector<8x8xbf16>, vector<8x8xf32> -> vector<8x8xf32>
    %c0_33 = arith.constant 0 : index
    %c24 = arith.constant 24 : index
    %101 = vector.load %arg10[%c0_33, %c24] : memref<8x32xf32, #tpu.memory_space<vmem>>, vector<8x8xf32>
    tpu.vector_store %arg10[%c0_33, %c24], %100 {strides = array<i32>} : memref<8x32xf32, #tpu.memory_space<vmem>>, vector<8x8xf32>,
    %c0_34 = arith.constant 0 : index
    %c0_35 = arith.constant 0 : index
    %102 = vector.load %arg10[%c0_34, %c0_35] : memref<8x32xf32, #tpu.memory_space<vmem>>, vector<8x32xf32>
    %c0_36 = arith.constant 0 : index
    %c0_37 = arith.constant 0 : index
    %103 = vector.load %arg5[%c0_36, %c0_37] : memref<32x32xbf16, #tpu.memory_space<vmem>>, vector<32x32xbf16>
    %104 = arith.truncf %102 : vector<8x32xf32> to vector<8x32xbf16>
    %cst_38 = arith.constant dense<0.000000e+00> : vector<8x32xf32>
    %105 = tpu.matmul %104, %103, %cst_38 {dimension_numbers = #tpu.dot_dimension_numbers<[1], [0], [0], [1], [0, 0, 1, 1], [], []>} : vector<8x32xbf16>, vector<32x32xbf16>, vector<8x32xf32> -> vector<8x32xf32>
    %c0_39 = arith.constant 0 : index
    %c0_40 = arith.constant 0 : index
    %106 = vector.load %arg6[%c0_39, %c0_40] : memref<1x32xf32, #tpu.memory_space<vmem>>, vector<1x32xf32>
    %107 = vector.broadcast %106 : vector<1x32xf32> to vector<8x32xf32>
    %108 = arith.addf %105, %107 : vector<8x32xf32>
    %109 = arith.addf %108, %2 : vector<8x32xf32>
    %c0_41 = arith.constant 0 : index
    %c0_42 = arith.constant 0 : index
    %110 = vector.load %arg7[%c0_41, %c0_42] : memref<1x32xf32, #tpu.memory_space<vmem>>, vector<1x32xf32>
    %c0_43 = arith.constant 0 : index
    %c0_44 = arith.constant 0 : index
    %111 = vector.load %arg8[%c0_43, %c0_44] : memref<1x32xf32, #tpu.memory_space<vmem>>, vector<1x32xf32>
    %cst_45 = arith.constant dense<0.000000e+00> : vector<8xf32>
    %112 = vector.multi_reduction <add>, %109, %cst_45 [1] : vector<8x32xf32> to vector<8xf32>
    %113 = vector.shape_cast %112 : vector<8xf32> to vector<8x1xf32>
    %cst_46 = arith.constant 3.200000e+01 : f32
    %114 = vector.broadcast %cst_46 : f32 to vector<8x1xf32>
    %115 = arith.divf %113, %114 : vector<8x1xf32>
    %116 = vector.broadcast %115 : vector<8x1xf32> to vector<8x32xf32>
    %117 = arith.subf %109, %116 : vector<8x32xf32>
    %118 = arith.mulf %117, %117 : vector<8x32xf32>
    %cst_47 = arith.constant dense<0.000000e+00> : vector<8xf32>
    %119 = vector.multi_reduction <add>, %118, %cst_47 [1] : vector<8x32xf32> to vector<8xf32>
    %120 = vector.shape_cast %119 : vector<8xf32> to vector<8x1xf32>
    %cst_48 = arith.constant 3.200000e+01 : f32
    %121 = vector.broadcast %cst_48 : f32 to vector<8x1xf32>
    %122 = arith.divf %120, %121 : vector<8x1xf32>
    %123 = vector.broadcast %115 : vector<8x1xf32> to vector<8x32xf32>
    %124 = arith.subf %109, %123 : vector<8x32xf32>
    %cst_49 = arith.constant 9.99999996E-13 : f32
    %125 = vector.broadcast %cst_49 : f32 to vector<8x1xf32>
    %126 = arith.addf %122, %125 : vector<8x1xf32>
    %127 = math.rsqrt %126 : vector<8x1xf32>
    %128 = vector.broadcast %127 : vector<8x1xf32> to vector<8x32xf32>
    %129 = arith.mulf %124, %128 : vector<8x32xf32>
    %130 = vector.broadcast %110 : vector<1x32xf32> to vector<8x32xf32>
    %131 = arith.mulf %129, %130 : vector<8x32xf32>
    %132 = vector.broadcast %111 : vector<1x32xf32> to vector<8x32xf32>
    %133 = arith.addf %131, %132 : vector<8x32xf32>
    %134 = arith.truncf %133 : vector<8x32xf32> to vector<8x32xbf16>
    %c0_50 = arith.constant 0 : index
    %c0_51 = arith.constant 0 : index
    %c0_52 = arith.constant 0 : index
    %135 = vector.load %arg9[%c0_50, %c0_51, %c0_52] : memref<1x8x32xbf16, #tpu.memory_space<vmem>>, vector<1x8x32xbf16>
    %136 = vector.shape_cast %135 : vector<1x8x32xbf16> to vector<8x32xbf16>
    %137 = vector.shape_cast %134 : vector<8x32xbf16> to vector<1x8x32xbf16>
    tpu.vector_store %arg9[%c0_50, %c0_51, %c0_52], %137 {strides = array<i32>} : memref<1x8x32xbf16, #tpu.memory_space<vmem>>, vector<1x8x32xbf16>,
    return
  }
  func.func @transform_0(%arg0: i32) -> (i32, i32, i32) {
    %c0_i32 = arith.constant 0 : i32
    %c0_i32_0 = arith.constant 0 : i32
    %c0_i32_1 = arith.constant 0 : i32
    return %arg0, %c0_i32, %c0_i32_0 : i32, i32, i32
  }
  func.func @transform_1(%arg0: i32) -> (i32, i32, i32) {
    %c0_i32 = arith.constant 0 : i32
    %c0_i32_0 = arith.constant 0 : i32
    %c0_i32_1 = arith.constant 0 : i32
    return %arg0, %c0_i32, %c0_i32_0 : i32, i32, i32
  }
  func.func @transform_2(%arg0: i32) -> (i32, i32) {
    %c0_i32 = arith.constant 0 : i32
    %c0_i32_0 = arith.constant 0 : i32
    %c0_i32_1 = arith.constant 0 : i32
    return %c0_i32, %c0_i32_0 : i32, i32
  }
  func.func @transform_3(%arg0: i32) -> (i32, i32) {
    %c0_i32 = arith.constant 0 : i32
    %c0_i32_0 = arith.constant 0 : i32
    %c0_i32_1 = arith.constant 0 : i32
    return %c0_i32, %c0_i32_0 : i32, i32
  }
  func.func @transform_4(%arg0: i32) -> (i32, i32) {
    %c0_i32 = arith.constant 0 : i32
    %c0_i32_0 = arith.constant 0 : i32
    %c0_i32_1 = arith.constant 0 : i32
    return %c0_i32, %c0_i32_0 : i32, i32
  }
  func.func @transform_5(%arg0: i32) -> (i32, i32) {
    %c0_i32 = arith.constant 0 : i32
    %c0_i32_0 = arith.constant 0 : i32
    %c0_i32_1 = arith.constant 0 : i32
    return %c0_i32, %c0_i32_0 : i32, i32
  }
  func.func @transform_6(%arg0: i32) -> (i32, i32) {
    %c0_i32 = arith.constant 0 : i32
    %c0_i32_0 = arith.constant 0 : i32
    %c0_i32_1 = arith.constant 0 : i32
    return %c0_i32, %c0_i32_0 : i32, i32
  }
  func.func @transform_7(%arg0: i32) -> (i32, i32) {
    %c0_i32 = arith.constant 0 : i32
    %c0_i32_0 = arith.constant 0 : i32
    %c0_i32_1 = arith.constant 0 : i32
    return %c0_i32, %c0_i32_0 : i32, i32
  }
  func.func @transform_8(%arg0: i32) -> (i32, i32, i32) {
    %c0_i32 = arith.constant 0 : i32
    %c0_i32_0 = arith.constant 0 : i32
    %c0_i32_1 = arith.constant 0 : i32
    return %arg0, %c0_i32, %c0_i32_0 : i32, i32, i32
  }
}

</mosaic_0001>

<bundles_post_ra>
// kernel: bert_classifier_forward.5
= control target key start
LH: loop header
LB: loop body
LE: loop exit
PB: predicated region body
PF: predicated region fallthrough
CT: control target
= control target key end

     0   :  { %s303_s12 = smov 0   ;;  %s326_s0 = inlined_call_operand.vmem [shape: f32[16,32], index: 0, kind: input, shape index: {}]   ;;  %s327_s1 = inlined_call_operand.vmem [shape: f32[1,32], index: 1, kind: input, shape index: {}]   ;;  %s328_s2 = inlined_call_operand.vmem [shape: f32[1,32], index: 2, kind: input, shape index: {}]   ;;  %s329_s3 = inlined_call_operand.vmem [shape: bf16[16,32], index: 3, kind: output, shape index: {}]  }
   0x1 LB: > { %s254_s13 = sadd.s32 4294967295, %s281_s12   ;;  %p258_p0 = scmp.ge.s32.totalorder %s281_s12, 1  ;;  %s281_s12 = sphi %s303_s12, %s13_s12  }
   0x2   : > { %p136_p1 = scmp.lt.s32.totalorder %s281_s12, 3 }
   0x4   : > { %p137_p2 = pnand %p258_p0, %p136_p1 }
   0x5   : > { %p158_p3 = scmp.lt.s32.totalorder (!%p137_p2), %s254_s13, 1  ;;  %vm169_vm0 = vcmask (!%p137_p2), 261120   ;;  %v261_v11 = vld [vmem:[%s327_s1] ss:$0 sm:$0xff] (!%p137_p2)  ;;  %vm199_vm1 = vcmask (!%p137_p2), 257024  }
   0x6   : > { %140 = sbr.rel (%p137_p2) target bundleno = 333 (0x14d), region = 32  ;;  %v262_v13 = vld [vmem:[%s328_s2] ss:$0 sm:$0xff] (!%p137_p2) }
   0xd   : > { %s331_s13 = smov (!%p158_p3, %s254_s13), 1 }
   0xe   : > { %s259_s14 = sshll.u32 %s331_s13, 3  ;;  %s260_s22 = sshll.u32 %s331_s13, 2 }
   0xf   : > { %s161_s17 = scalar_lea.vmem %s326_s0, %s259_s14  ;;  %s165_s25 = scalar_lea.vmem %s329_s3, %s260_s22 }
  0x10   : > { %v166_v0 = vld [vmem:[%s161_s17] sm:$0xff] }
  0x11   : > { %v170_v1 = vsel %vm169_vm0, %v166_v0, 0.0 }
  0x12   : > { %171 = vadd.xlane.f32.xlu0 %v170_v1 }
  0x9f   : > { %v172_v2 = vpop.xlane.xlu0 %171 }
  0xa0   : > { %v174_v3 = vmul.f32 0.03125, %v172_v2 }
  0xa2   : > { %v175_v4 = vsub.f32 %v166_v0, %v174_v3 }
  0xa4   : > { %v176_v5 = vmul.f32 %v175_v4, %v175_v4 }
  0xa6   : > { %v177_v6 = vsel %vm169_vm0, %v176_v5, 0.0 }
  0xa7   : > { %178 = vadd.xlane.f32.xlu0 %v177_v6 }
 0x134   : > { %v179_v7 = vpop.xlane.xlu0 %178 }
 0x135   : > { %v180_v8 = vmul.f32 0.03125, %v179_v7 }
 0x137   : > { %v181_v9 = vadd.f32 1e-12, %v180_v8 }
 0x139   : > { %273 = vrsqrt.f32 %v181_v9 }
 0x143   : > { %v274_v10 = vpop.eup %273 }
 0x144   : > { %v183_v12 = vmul.f32 %v274_v10, %v175_v4 }
 0x146   : > { %v190_v14 = vmul.f32 %v261_v11, %v183_v12 }
 0x148   : > { %v197_v15 = vadd.f32 %v262_v13, %v190_v14 }
 0x14a   : > { %v198_v16 = vpack.c.bf16 %v197_v15, %v197_v15 }
 0x14c   : > { %200 = vst.msk [vmem:[%s165_s25] sm:$0xf] %vm199_vm1, %v198_v16 }
 0x14d PF: > { %s13_s12 = sadd.s32 1, %s281_s12  }
 0x14e   : > { %p10_p4 = scmp.ge.s32.totalorder %s13_s12, 4  }
 0x150   :  { %12 = sbr.rel (!%p10_p4) target bundleno = 1 (0x1), region = 62 }

// kernel: bert_classifier_forward.7
= control target key start
LH: loop header
LB: loop body
LE: loop exit
PB: predicated region body
PF: predicated region fallthrough
CT: control target
= control target key end

     0   :  { %s808_s24 = smov 0   ;;  %s810_s25 = smov 0   ;;  %s883_s0 = inlined_call_operand.vmem [shape: bf16[16,32], index: 0, kind: input, shape index: {}]   ;;  %s884_s1 = inlined_call_operand.vmem [shape: bf16[32,64], index: 1, kind: input, shape index: {}]   ;;  %s885_s2 = inlined_call_operand.vmem [shape: f32[1,64], index: 2, kind: input, shape index: {}]   ;;  %s886_s3 = inlined_call_operand.vmem [shape: bf16[64,32], index: 3, kind: input, shape index: {}]   ;;  %s887_s4 = inlined_call_operand.vmem [shape: f32[1,32], index: 4, kind: input, shape index: {}]   ;;  %s888_s5 = inlined_call_operand.vmem [shape: f32[1,32], index: 5, kind: input, shape index: {}]   ;;  %s889_s6 = inlined_call_operand.vmem [shape: f32[1,32], index: 6, kind: input, shape index: {}]   ;;  %s890_s7 = inlined_call_operand.vmem [shape: bf16[16,32], index: 7, kind: output, shape index: {}]  }
   0x1   :  { %s812_s26 = smov 0  }
   0x2 LB: > { %s29_s27 = sadd.s32 1, %s760_s25  ;;  %p661_p0 = scmp.ge.s32.totalorder %s764_s26, 1  ;;  %s764_s26 = sphi %s812_s26, %s17_s26   ;;  %s760_s25 = sphi %s810_s25, %s892_s25   ;;  %s756_s24 = sphi %s808_s24, %s891_s24  }
   0x3   : > { %p31_p1 = scmp.ge.s32.totalorder %s29_s27, 2  ;;  %p276_p2 = scmp.lt.s32.totalorder %s764_s26, 3 }
   0x5   : > { %s894_s27 = smov (%p31_p1, %s29_s27), 0  ;;  %p277_p3 = pnand %p661_p0, %p276_p2 }
   0x6   : > { %v732_v0 = vld [vmem:[%s884_s1] sm:$0xff] (!%p277_p3)   ;;  %v766_v1 = vmov (!%p277_p3), 0.0   ;;  %v733_v2 = vld [vmem:[%s884_s1 + $0x8] sm:$0xff] (!%p277_p3)   ;;  %vm767_vm0 = vmmov (!%p277_p3), 0   ;;  %p318_p4 = scmp.lt.s32.totalorder (!%p277_p3), %s756_s24, 1  ;;  %vm344_vm1 = vcmask (!%p277_p3), 261120  }
   0x7   : > { %280 = sbr.rel (%p277_p3) target bundleno = 801 (0x321), region = 48  ;;  %686 = vmatprep.subr.bf16.mxu0 (!%p277_p3), %v766_v1  ;;  %694 = vmatprep.subr.bf16.mxu1 (!%p277_p3), %v766_v1  ;;  %345 = vst.msk [vmem:[#allocation2] sm:$0xff] (!%p277_p3), %vm344_vm1, %v766_v1  ;;  %v734_v4 = vld [vmem:[%s886_s3] sm:$0xff] (!%p277_p3)   ;;  %v735_v5 = vld [vmem:[%s886_s3 + $0x8] sm:$0xff] (!%p277_p3)   ;;  %v736_v6 = vld [vmem:[%s886_s3 + $0x10] sm:$0xff] (!%p277_p3)   ;;  %vm457_vm2 = vcmask (!%p277_p3), 523264  }
   0x8   : > { %687 = vmatpush3.bf16.msra.mxu0 (!%p277_p3), %v732_v0  ;;  %690 = vmatprep.mubr.msk.bf16.mxu0 (!%p277_p3), %vm767_vm0, %v766_v1  ;;  %v737_v7 = vld [vmem:[%s886_s3 + $0x18] sm:$0xff] (!%p277_p3)   ;;  %v664_v8 = vld [vmem:[%s885_s2] ss:$0 sm:$0xff] (!%p277_p3)  ;;  %vm548_vm3 = vcmask (!%p277_p3), 257024  }
   0x9   : > { %688 = vmatprep.subr.bf16.mxu0 (!%p277_p3), %v766_v1  ;;  %702 = vmatprep.mubr.msk.bf16.mxu1 (!%p277_p3), %vm767_vm0, %v766_v1  ;;  %v673_v30 = vld [vmem:[%s887_s4] ss:$0 sm:$0xff] (!%p277_p3) }
   0xa   : > { %695 = vmatpush3.bf16.msra.mxu1 (!%p277_p3), %v734_v4  ;;  %v674_v45 = vld [vmem:[%s888_s5] ss:$0 sm:$0xff] (!%p277_p3) }
   0xb   : > { %696 = vmatprep.subr.bf16.mxu1 (!%p277_p3), %v766_v1  ;;  %v675_v47 = vld [vmem:[%s889_s6] ss:$0 sm:$0xff] (!%p277_p3) }
   0xc   : > { %689 = vmatpush3.bf16.msra.mxu0 (!%p277_p3), %v733_v2 }
   0xe   : > { %s896_s24 = smov (!%p318_p4, %s756_s24), 1  ;;  %697 = vmatpush3.bf16.msra.mxu1 %v735_v5  ;;  %v423_v24 = vld [vmem:[#allocation2] sm:$0xff] }
   0xf   : > { %s662_s9 = sshll.u32 %s896_s24, 2  ;;  %698 = vmatprep.subr.bf16.mxu1 %v766_v1 }
  0x10   : > { %s321_s12 = scalar_lea.vmem %s883_s0, %s662_s9  ;;  %s338_s13 = scalar_lea.vmem %s890_s7, %s662_s9 }
  0x11   : > { %v346_v3 = vld [vmem:[%s321_s12] sm:$0xf] }
  0x12   : > { %691 = vmatmul.mubr.msk.bf16.vlgmr.msra.gmra.mrb[0].mxu0 %vm344_vm1, %v346_v3  ;;  %699 = vmatpush3.bf16.msra.mxu1 %v736_v6  ;;  %v515_v31 = vunpack.c.l.bf16 %v346_v3 }
  0x13   : > { %700 = vmatprep.subr.bf16.mxu1 %v766_v1 }
  0x16   : > { %701 = vmatpush3.bf16.msra.mxu1 %v737_v7 }
  0xe5   : > { %v408_v9 = vpop.f32.mrb[0].mxu0 }
  0xe6   : > { %v409_v10 = vadd.f32 %v664_v8, %v408_v9  ;;  %v692_v11 = vpop.f32.mrb[1].mxu0 }
  0xe7   : > { %v411_v12 = vpop.f32.mrb[2].mxu0 }
  0xe8   : > { %v415_v13 = vmul.f32 0.044715, %v409_v10  ;;  %v693_v14 = vpop.f32.mrb[3].mxu0  ;;  %v414_v20 = vmul.f32 0.5, %v409_v10 }
  0xea   : > { %v416_v15 = vmul.f32 %v415_v13, %v409_v10 }
  0xec   : > { %v417_v16 = vmul.f32 %v416_v15, %v409_v10 }
  0xee   : > { %v418_v17 = vadd.f32 %v417_v16, %v409_v10 }
  0xf0   : > { %v419_v18 = vmul.f32 0.7978846, %v418_v17 }
  0xf2   : > { %738 = vtanh.f32 %v419_v18 }
  0xfc   : > { %v739_v19 = vpop.eup %738 }
  0xfd   : > { %v421_v21 = vadd.f32 1.0, %v739_v19 }
  0xff   : > { %v422_v22 = vmul.f32 %v421_v21, %v414_v20 }
 0x101   : > { %v432_v23 = vpack.c.bf16 %v422_v22, %v422_v22 }
 0x103   : > { %703 = vmatmul.mubr.msk.bf16.vlgmr.msra.gmra.mrb[0].mxu1 %vm457_vm2, %v432_v23 }
 0x1d6   : > { %v495_v25 = vpop.f32.mrb[0].mxu1 }
 0x1d7   : > { %v501_v26 = vadd.f32 %v495_v25, %v423_v24  ;;  %v704_v27 = vpop.f32.mrb[1].mxu1 }
 0x1d8   : > { %v498_v28 = vpop.f32.mrb[2].mxu1 }
 0x1d9   : > { %502 = vst.msk [vmem:[#allocation2] sm:$0xff] %vm344_vm1, %v501_v26  ;;  %v705_v29 = vpop.f32.mrb[3].mxu1 }
 0x1e0   : > { %v506_v32 = vld [vmem:[#allocation2] sm:$0xff] }
 0x1e1   : > { %v514_v33 = vadd.f32 %v673_v30, %v506_v32 }
 0x1e3   : > { %v516_v34 = vadd.f32 %v515_v31, %v514_v33 }
 0x1e5   : > { %v519_v35 = vsel %vm344_vm1, %v516_v34, 0.0 }
 0x1e6   : > { %520 = vadd.xlane.f32.xlu0 %v519_v35 }
 0x273   : > { %v521_v36 = vpop.xlane.xlu0 %520 }
 0x274   : > { %v523_v37 = vmul.f32 0.03125, %v521_v36 }
 0x276   : > { %v524_v38 = vsub.f32 %v516_v34, %v523_v37 }
 0x278   : > { %v525_v39 = vmul.f32 %v524_v38, %v524_v38 }
 0x27a   : > { %v526_v40 = vsel %vm344_vm1, %v525_v39, 0.0 }
 0x27b   : > { %527 = vadd.xlane.f32.xlu0 %v526_v40 }
 0x308   : > { %v528_v41 = vpop.xlane.xlu0 %527 }
 0x309   : > { %v529_v42 = vmul.f32 0.03125, %v528_v41 }
 0x30b   : > { %v530_v43 = vadd.f32 1e-12, %v529_v42 }
 0x30d   : > { %740 = vrsqrt.f32 %v530_v43 }
 0x317   : > { %v741_v44 = vpop.eup %740 }
 0x318   : > { %v532_v46 = vmul.f32 %v741_v44, %v524_v38 }
 0x31a   : > { %v539_v48 = vmul.f32 %v674_v45, %v532_v46 }
 0x31c   : > { %v546_v49 = vadd.f32 %v675_v47, %v539_v48 }
 0x31e   : > { %v547_v50 = vpack.c.bf16 %v546_v49, %v546_v49 }
 0x320   : > { %549 = vst.msk [vmem:[%s338_s13] sm:$0xf] %vm548_vm3, %v547_v50 }
 0x321 PF: > { %s17_s26 = sadd.s32 1, %s764_s26   ;;  %s891_s24 = smov %s760_s25 }
 0x322   : > { %p14_p5 = scmp.ge.s32.totalorder %s17_s26, 4   ;;  %s892_s25 = smov %s894_s27 }
 0x324   :  { %16 = sbr.rel (!%p14_p5) target bundleno = 2 (0x2), region = 95 }

// kernel: bert_classifier_forward.6
= control target key start
LH: loop header
LB: loop body
LE: loop exit
PB: predicated region body
PF: predicated region fallthrough
CT: control target
= control target key end

     0   :  { %s1254_s27 = smov 0   ;;  %s1385_s0 = inlined_call_operand.vmem [shape: bf16[2,8,32], index: 0, kind: input, shape index: {}]   ;;  %s1386_s1 = inlined_call_operand.vmem [shape: f32[2,1,8], index: 1, kind: input, shape index: {}]   ;;  %s1387_s2 = inlined_call_operand.vmem [shape: bf16[32,96], index: 2, kind: input, shape index: {}]   ;;  %s1388_s3 = inlined_call_operand.vmem [shape: f32[1,96], index: 3, kind: input, shape index: {}]   ;;  %s1389_s4 = inlined_call_operand.vmem [shape: bf16[32,32], index: 4, kind: input, shape index: {}]   ;;  %s1390_s5 = inlined_call_operand.vmem [shape: f32[1,32], index: 5, kind: input, shape index: {}]   ;;  %s1391_s6 = inlined_call_operand.vmem [shape: f32[1,32], index: 6, kind: input, shape index: {}]   ;;  %s1392_s7 = inlined_call_operand.vmem [shape: f32[1,32], index: 7, kind: input, shape index: {}]   ;;  %s1393_s8 = inlined_call_operand.vmem [shape: bf16[2,8,32], index: 8, kind: output, shape index: {}]  }
   0x1 LB: > { %s1025_s28 = sadd.s32 4294967295, %s1191_s27   ;;  %p1029_p0 = scmp.ge.s32.totalorder %s1191_s27, 1  ;;  %s1191_s27 = sphi %s1254_s27, %s18_s27  }
   0x2   : > { %p269_p1 = scmp.lt.s32.totalorder %s1191_s27, 3 }
   0x4   : > { %p270_p2 = pnand %p1029_p0, %p269_p1 }
   0x5   : > { %v1163_v0 = vld [vmem:[%s1387_s2] sm:$0xff] (!%p270_p2)   ;;  %v1193_v1 = vmov (!%p270_p2), 0.0   ;;  %v1164_v2 = vld [vmem:[%s1387_s2 + $0x8] sm:$0xff] (!%p270_p2)   ;;  %vm1194_vm0 = vmmov (!%p270_p2), 0   ;;  %p304_p3 = scmp.lt.s32.totalorder (!%p270_p2), %s1025_s28, 1  ;;  %vm342_vm1 = vcmask (!%p270_p2), 261120  }
   0x6   : > { %273 = sbr.rel (%p270_p2) target bundleno = 1819 (0x71b), region = 52  ;;  %1075 = vmatprep.subr.bf16.mxu0 (!%p270_p2), %v1193_v1  ;;  %1083 = vmatprep.subr.bf16.mxu1 (!%p270_p2), %v1193_v1  ;;  %v1032_v4 = vld [vmem:[%s1388_s3] ss:$0 sm:$0xff] (!%p270_p2)  ;;  %s1195_s17 = smov (!%p270_p2), 120   ;;  %vm390_vm2 = vcmask (!%p270_p2), 64512   ;;  %vm462_vm3 = vcmask (!%p270_p2), 1043456  }
   0x7   : > { %1076 = vmatpush3.bf16.msra.mxu0 (!%p270_p2), %v1163_v0  ;;  %1079 = vmatprep.mubr.msk.bf16.mxu0 (!%p270_p2), %vm1194_vm0, %v1193_v1  ;;  %s1196_s18 = smov (!%p270_p2), 96   ;;  %s1197_s19 = smov (!%p270_p2), 80   ;;  %vm623_vm4 = vcmask (!%p270_p2), 130112   ;;  %vm741_vm5 = vcmask (!%p270_p2), 195712   ;;  %vm859_vm6 = vcmask (!%p270_p2), 261312   ;;  %vm961_vm7 = vcmask (!%p270_p2), 257024  }
   0x8   : > { %1077 = vmatprep.subr.bf16.mxu0 (!%p270_p2), %v1193_v1  ;;  %1085 = vmatprep.mubr.msk.bf16.mxu1 (!%p270_p2), %vm1194_vm0, %v1193_v1  ;;  %s1198_s20 = smov (!%p270_p2), 88   ;;  %s1199_s21 = smov (!%p270_p2), 72  }
   0x9   : > { %s1200_s22 = smov (!%p270_p2), 112   ;;  %s1201_s23 = smov (!%p270_p2), 104  }
   0xa   : > { %s1202_s29 = smov (!%p270_p2), 56   ;;  %s1203_s30 = smov (!%p270_p2), 64  }
   0xb   : > { %1078 = vmatpush3.bf16.msra.mxu0 (!%p270_p2), %v1164_v2  ;;  %s1204_s9 = smov (!%p270_p2), 40   ;;  %s1205_s10 = smov (!%p270_p2), 48  }
   0xc   : > { %1089 = vmatprep.subr.bf16.mxu0 (!%p270_p2), %v1193_v1  ;;  %s1206_s12 = smov (!%p270_p2), 8  }
   0xd   : > { %s1395_s28 = smov (!%p304_p3, %s1025_s28), 1 }
   0xe   : > { %s1030_s11 = sshll.u32 %s1395_s28, 2  ;;  %s310_s26 = scalar_lea.vmem %s1386_s1, %s1395_s28 }
   0xf   : > { %s307_s14 = scalar_lea.vmem %s1385_s0, %s1030_s11  ;;  %v1037_v23 = vld [vmem:[%s310_s26] ss:$0 sm:$0xff] }
  0x10   : > { %v1284_v3 = vld [vmem:[%s307_s14] sm:$0xf] }
  0x11   : > { %1080 = vmatmul.mubr.msk.bf16.vlgmr.msra.gmra.mrb[0].mxu0 %vm342_vm1, %v1284_v3 }
  0x12   : > { %1091 = vmatprep.mubr.msk.bf16.mxu0 %vm1194_vm0, %v1193_v1 }
  0xe4   : > { %v380_v5 = vpop.f32.mrb[0].mxu0 }
  0xe5   : > { %v381_v6 = vadd.f32 %v1032_v4, %v380_v5  ;;  %v1081_v7 = vpop.f32.mrb[1].mxu0 }
  0xe6   : > { %v383_v8 = vpop.f32.mrb[2].mxu0 }
  0xe7   : > { %v1293_v9 = vpack.c.bf16 %v381_v6, %v381_v6  ;;  %v1082_v10 = vpop.f32.mrb[3].mxu0 }
  0xe9   : > { %507 = vrot.lane.b32.xlu1 %v1293_v9, %s1195_s17  ;;  %388 = vrot.lane.b32.xlu0 %v1293_v9, %s1196_s18  ;;  %s1207_s17 = smov 16   ;;  %s1208_s18 = smov 24  }
  0xed   : > { %627 = vrot.lane.b32.xlu1 %v1293_v9, %s1197_s19  ;;  %509 = vrot.lane.b32.xlu0 %v1293_v9, %s1198_s20 }
  0xf1   : > { %745 = vrot.lane.b32.xlu1 %v1293_v9, %s1199_s21  ;;  %625 = vrot.lane.b32.xlu0 %v1293_v9, %s1200_s22 }
  0xf5   : > { %743 = vrot.lane.b32.xlu0 %v1293_v9, %s1201_s23 }
 0x15b   : > { %v389_v11 = vpop.permute.xlu0 %388  ;;  %v508_v14 = vpop.permute.xlu1 %507 }
 0x15c   : > { %v395_v12 = vsel %vm390_vm2, %v389_v11, 0 }
 0x15d   : > { %1084 = vmatpush3.bf16.xpose.msra.mxu1 %v395_v12 }
 0x15e   : > { %1095 = vmatprep.subr.bf16.mxu1 %v1193_v1 }
 0x15f   : > { %v510_v13 = vpop.permute.xlu0 %509  ;;  %v628_v16 = vpop.permute.xlu1 %627 }
 0x160   : > { %v515_v15 = vsel %vm390_vm2, %v510_v13, 0  ;;  %v633_v17 = vsel %vm390_vm2, %v628_v16, 0 }
 0x163   : > { %v746_v18 = vpop.permute.xlu1 %745  ;;  %v626_v19 = vpop.permute.xlu0 %625 }
 0x164   : > { %1086 = vmatmul.mubr.msk.bf16.vlgmr.msra.gmra.mrb[0].mxu1 %vm390_vm2, %v1293_v9  ;;  %v751_v20 = vsel %vm390_vm2, %v746_v18, 0 }
 0x165   : > { %1096 = vmatpush3.bf16.xpose.msra.mxu1 %v515_v15  ;;  %1097 = vmatprep.mubr.msk.bf16.mxu1 %vm1194_vm0, %v1193_v1 }
 0x166   : > { %1107 = vmatprep.subr.bf16.mxu1 %v1193_v1 }
 0x167   : > { %v744_v21 = vpop.permute.xlu0 %743 }
 0x16c   : > { %1098 = vmatmul.mubr.msk.bf16.vlgmr.msra.gmra.mrb[4].mxu1 %vm390_vm2, %v508_v14 }
 0x16d   : > { %1108 = vmatpush3.bf16.xpose.msra.mxu1 %v633_v17  ;;  %1109 = vmatprep.mubr.msk.bf16.mxu1 %vm1194_vm0, %v1193_v1 }
 0x16e   : > { %1119 = vmatprep.subr.bf16.mxu1 %v1193_v1 }
 0x174   : > { %1110 = vmatmul.mubr.msk.bf16.vlgmr.msra.gmra.mrb[8].mxu1 %vm390_vm2, %v626_v19 }
 0x175   : > { %1120 = vmatpush3.bf16.xpose.msra.mxu1 %v751_v20  ;;  %1121 = vmatprep.mubr.msk.bf16.mxu1 %vm1194_vm0, %v1193_v1 }
 0x176   : > { %1131 = vmatprep.subr.bf16.mxu1 %v1193_v1 }
 0x17c   : > { %1122 = vmatmul.mubr.msk.bf16.vlgmr.msra.gmra.mrb[12].mxu1 %vm390_vm2, %v744_v21 }
 0x17d   : > { %1135 = vmatprep.mubr.msk.bf16.mxu1 %vm1194_vm0, %v1193_v1 }
 0x237   : > { %v431_v22 = vpop.f32.mrb[0].mxu1 }
 0x238   : > { %v437_v24 = vmul.f32 0.35355338, %v431_v22  ;;  %v1087_v25 = vpop.f32.mrb[1].mxu1 }
 0x239   : > { %v434_v26 = vpop.f32.mrb[2].mxu1 }
 0x23a   : > { %v1088_v27 = vpop.f32.mrb[3].mxu1  ;;  %v444_v28 = vadd.f32 %v1037_v23, %v437_v24 }
 0x23c   : > { %v445_v29 = vsel %vm390_vm2, %v444_v28, -inf }
 0x23d   : > { %446 = vmax.xlane.f32.xlu1 %v445_v29 }
 0x23f   : > { %v551_v30 = vpop.f32.mrb[4].mxu1 }
 0x240   : > { %v557_v31 = vmul.f32 0.35355338, %v551_v30  ;;  %v1099_v32 = vpop.f32.mrb[5].mxu1 }
 0x241   : > { %v554_v33 = vpop.f32.mrb[6].mxu1 }
 0x242   : > { %v1100_v34 = vpop.f32.mrb[7].mxu1  ;;  %v558_v35 = vadd.f32 %v1037_v23, %v557_v31 }
 0x244   : > { %v559_v36 = vsel %vm390_vm2, %v558_v35, -inf }
 0x245   : > { %560 = vmax.xlane.f32.xlu0 %v559_v36 }
 0x247   : > { %v669_v37 = vpop.f32.mrb[8].mxu1 }
 0x248   : > { %v675_v38 = vmul.f32 0.35355338, %v669_v37  ;;  %v1111_v39 = vpop.f32.mrb[9].mxu1 }
 0x249   : > { %v672_v40 = vpop.f32.mrb[10].mxu1 }
 0x24a   : > { %v1112_v41 = vpop.f32.mrb[11].mxu1  ;;  %v676_v42 = vadd.f32 %v1037_v23, %v675_v38 }
 0x24b   : > { %v1165_v41 = vld [vmem:[%s1389_s4] sm:$0xff]  }
 0x24c   : > { %v677_v43 = vsel %vm390_vm2, %v676_v42, -inf  ;;  %1132 = vmatpush3.bf16.msra.mxu1 %v1165_v41 }
 0x24d   : > { %678 = vmax.xlane.f32.xlu0 %v677_v43  ;;  %1133 = vmatprep.subr.bf16.mxu1 %v1193_v1 }
 0x24f   : > { %v787_v44 = vpop.f32.mrb[12].mxu1 }
 0x250   : > { %v793_v45 = vmul.f32 0.35355338, %v787_v44  ;;  %v1123_v46 = vpop.f32.mrb[13].mxu1 }
 0x251   : > { %v790_v47 = vpop.f32.mrb[14].mxu1 }
 0x252   : > { %v1124_v48 = vpop.f32.mrb[15].mxu1  ;;  %v794_v49 = vadd.f32 %v1037_v23, %v793_v45 }
 0x254   : > { %v795_v50 = vsel %vm390_vm2, %v794_v49, -inf }
 0x255   : > { %796 = vmax.xlane.f32.xlu1 %v795_v50 }
 0x2ca   : > { %v447_v51 = vpop.xlane.xlu1 %446 }
 0x2cb   : > { %v448_v52 = vsub.f32 %v444_v28, %v447_v51 }
 0x2cd   : > { %v449_v53 = vmul.f32 1.442695, %v448_v52 }
 0x2cf   : > { %1167 = vpow2.f32 %v449_v53 }
 0x2d2   : > { %v561_v54 = vpop.xlane.xlu0 %560 }
 0x2d3   : > { %v562_v55 = vsub.f32 %v558_v35, %v561_v54 }
 0x2d5   : > { %v563_v56 = vmul.f32 1.442695, %v562_v55  ;;  %v1045_v55 = vld [vmem:[%s1390_s5] ss:$0 sm:$0xff] }
 0x2d7   : > { %1169 = vpow2.f32 %v563_v56  ;;  %v317_v56 = vunpack.c.l.bf16 %v1284_v3 }
 0x2d9   : > { %v1168_v57 = vpop.eup %1167 }
 0x2da   : > { %v679_v58 = vpop.xlane.xlu0 %678  ;;  %v451_v59 = vsel %vm390_vm2, %v1168_v57, 0.0 }
 0x2db   : > { %v680_v60 = vsub.f32 %v676_v42, %v679_v58  ;;  %452 = vadd.xlane.f32.xlu0 %v451_v59  ;;  %v1166_v42 = vld [vmem:[%s1389_s4 + $0x8] sm:$0xff]  }
 0x2dc   : > { %1134 = vmatpush3.bf16.msra.mxu1 %v1166_v42 }
 0x2dd   : > { %v681_v61 = vmul.f32 1.442695, %v680_v60 }
 0x2df   : > { %1171 = vpow2.f32 %v681_v61 }
 0x2e1   : > { %v1170_v62 = vpop.eup %1169 }
 0x2e2   : > { %v565_v63 = vsel %vm390_vm2, %v1170_v62, 0.0  ;;  %v797_v4 = vpop.xlane.xlu1 %796 }
 0x2e3   : > { %566 = vadd.xlane.f32.xlu1 %v565_v63  ;;  %v798_v5 = vsub.f32 %v794_v49, %v797_v4 }
 0x2e5   : > { %v799_v6 = vmul.f32 1.442695, %v798_v5 }
 0x2e7   : > { %1173 = vpow2.f32 %v799_v6 }
 0x2e9   : > { %v1172_v0 = vpop.eup %1171 }
 0x2ea   : > { %v683_v2 = vsel %vm390_vm2, %v1172_v0, 0.0 }
 0x2eb   : > { %684 = vadd.xlane.f32.xlu0 %v683_v2 }
 0x2f1   : > { %v1174_v7 = vpop.eup %1173 }
 0x2f2   : > { %v801_v8 = vsel %vm390_vm2, %v1174_v7, 0.0 }
 0x2f4   : > { %571 = vrot.lane.b32.xlu1 %v1293_v9, %s1202_s29  ;;  %s314_s29 = scalar_lea.vmem %s1393_s8, %s1030_s11 }
 0x301   : > { %457 = vrot.lane.b32.xlu0 %v1293_v9, %s1203_s30 }
 0x305   : > { %807 = vrot.lane.b32.xlu0 %v1293_v9, %s1204_s9 }
 0x318   : > { %802 = vadd.xlane.f32.xlu1 %v801_v8 }
 0x329   : > { %689 = vrot.lane.b32.xlu1 %v1293_v9, %s1205_s10 }
 0x368   : > { %v453_v10 = vpop.xlane.xlu0 %452 }
 0x369   : > { %1175 = vrcp.f32 %v453_v10 }
 0x370   : > { %v567_v11 = vpop.xlane.xlu1 %566 }
 0x371   : > { %1177 = vrcp.f32 %v567_v11  ;;  %v1049_v11 = vld [vmem:[%s1391_s6] ss:$0 sm:$0xff] }
 0x373   : > { %v1176_v12 = vpop.eup %1175 }
 0x374   : > { %v455_v14 = vmul.f32 %v1176_v12, %v1168_v57  ;;  %v572_v17 = vpop.permute.xlu1 %571 }
 0x375   : > { %v577_v20 = vsel %vm462_vm3, %v572_v17, 0 }
 0x376   : > { %v456_v18 = vpack.c.bf16 %v455_v14, %v455_v14 }
 0x378   : > { %v685_v13 = vpop.xlane.xlu0 %684 }
 0x379   : > { %1179 = vrcp.f32 %v685_v13  ;;  %v1050_v13 = vld [vmem:[%s1392_s7] ss:$0 sm:$0xff] }
 0x37b   : > { %v1178_v19 = vpop.eup %1177 }
 0x37c   : > { %v458_v15 = vpop.permute.xlu0 %457  ;;  %v569_v9 = vmul.f32 %v1178_v19, %v1170_v62 }
 0x37d   : > { %v464_v16 = vsel %vm462_vm3, %v458_v15, 0 }
 0x37e   : > { %1090 = vmatpush3.bf16.msra.mxu0 %v464_v16  ;;  %v570_v21 = vpack.c.bf16 %v569_v9, %v569_v9 }
 0x37f   : > { %1101 = vmatprep.subr.bf16.mxu0 %v1193_v1 }
 0x380   : > { %v808_v27 = vpop.permute.xlu0 %807 }
 0x381   : > { %1092 = vmatmul.mubr.msk.bf16.vlgmr.msra.gmra.mrb[4].mxu0 %vm390_vm2, %v456_v18  ;;  %v813_v29 = vsel %vm462_vm3, %v808_v27, 0 }
 0x382   : > { %1102 = vmatpush3.bf16.msra.mxu0 %v577_v20  ;;  %1103 = vmatprep.mubr.msk.bf16.mxu0 %vm1194_vm0, %v1193_v1 }
 0x383   : > { %1113 = vmatprep.subr.bf16.mxu0 %v1193_v1  ;;  %v1180_v22 = vpop.eup %1179 }
 0x384   : > { %v687_v24 = vmul.f32 %v1180_v22, %v1172_v0 }
 0x386   : > { %v688_v28 = vpack.c.bf16 %v687_v24, %v687_v24 }
 0x389   : > { %1104 = vmatmul.mubr.msk.bf16.vlgmr.msra.gmra.mrb[8].mxu0 %vm390_vm2, %v570_v21 }
 0x38a   : > { %1115 = vmatprep.mubr.msk.bf16.mxu0 %vm1194_vm0, %v1193_v1 }
 0x3a5   : > { %v803_v23 = vpop.xlane.xlu1 %802 }
 0x3a6   : > { %1181 = vrcp.f32 %v803_v23 }
 0x3a9   : > { %v690_v25 = vpop.permute.xlu1 %689 }
 0x3aa   : > { %v695_v26 = vsel %vm462_vm3, %v690_v25, 0 }
 0x3ab   : > { %1114 = vmatpush3.bf16.msra.mxu0 %v695_v26 }
 0x3ac   : > { %1125 = vmatprep.subr.bf16.mxu0 %v1193_v1 }
 0x3ae   : > { %1116 = vmatmul.mubr.msk.bf16.vlgmr.msra.gmra.mrb[12].mxu0 %vm390_vm2, %v688_v28 }
 0x3af   : > { %1126 = vmatpush3.bf16.msra.mxu0 %v813_v29  ;;  %1127 = vmatprep.mubr.msk.bf16.mxu0 %vm1194_vm0, %v1193_v1 }
 0x3b0   : > { %v1182_v30 = vpop.eup %1181 }
 0x3b1   : > { %v805_v31 = vmul.f32 %v1182_v30, %v1174_v7 }
 0x3b3   : > { %v806_v32 = vpack.c.bf16 %v805_v31, %v805_v31 }
 0x3b6   : > { %1128 = vmatmul.mubr.msk.bf16.vlgmr.msra.gmra.mrb[16].mxu0 %vm390_vm2, %v806_v32 }
 0x454   : > { %v500_v33 = vpop.f32.mrb[4].mxu0 }
 0x455   : > { %506 = vst.msk [vmem:[#allocation2] sm:$0xff] %vm390_vm2, %v500_v33  ;;  %v1093_v34 = vpop.f32.mrb[5].mxu0 }
 0x456   : > { %v503_v35 = vpop.f32.mrb[6].mxu0 }
 0x457   : > { %v1094_v36 = vpop.f32.mrb[7].mxu0 }
 0x45c   : > { %v613_v37 = vpop.f32.mrb[8].mxu0 }
 0x45d   : > { %620 = vrot.lane.b32.xlu1 %v613_v37, %s1206_s12  ;;  %v1105_v38 = vpop.f32.mrb[9].mxu0 }
 0x45e   : > { %v616_v39 = vpop.f32.mrb[10].mxu0 }
 0x45f   : > { %v1106_v40 = vpop.f32.mrb[11].mxu0 }
 0x481   : > { %v731_v43 = vpop.f32.mrb[12].mxu0 }
 0x482   : > { %738 = vrot.lane.b32.xlu0 %v731_v43, %s1207_s17  ;;  %v1117_v44 = vpop.f32.mrb[13].mxu0 }
 0x483   : > { %v734_v45 = vpop.f32.mrb[14].mxu0 }
 0x484   : > { %v1118_v46 = vpop.f32.mrb[15].mxu0 }
 0x489   : > { %v849_v47 = vpop.f32.mrb[16].mxu0 }
 0x48a   : > { %856 = vrot.lane.b32.xlu1 %v849_v47, %s1208_s18  ;;  %v1129_v48 = vpop.f32.mrb[17].mxu0 }
 0x48b   : > { %v852_v49 = vpop.f32.mrb[18].mxu0 }
 0x48c   : > { %v1130_v50 = vpop.f32.mrb[19].mxu0 }
 0x4cf   : > { %v621_v51 = vpop.permute.xlu1 %620 }
 0x4d0   : > { %624 = vst.msk [vmem:[#allocation2] sm:$0xff] %vm623_vm4, %v621_v51 }
 0x4f4   : > { %v739_v52 = vpop.permute.xlu0 %738 }
 0x4f5   : > { %742 = vst.msk [vmem:[#allocation2] sm:$0xff] %vm741_vm5, %v739_v52 }
 0x4fc   : > { %v857_v1 = vpop.permute.xlu1 %856 }
 0x4fd   : > { %860 = vst.msk [vmem:[#allocation2] sm:$0xff] %vm859_vm6, %v857_v1 }
 0x504   : > { %v861_v53 = vld [vmem:[#allocation2] sm:$0xff] }
 0x505   : > { %v866_v54 = vpack.c.bf16 %v861_v53, %v861_v53 }
 0x507   : > { %1136 = vmatmul.mubr.msk.bf16.vlgmr.msra.gmra.mrb[16].mxu1 %vm342_vm1, %v866_v54 }
 0x5da   : > { %v923_v57 = vpop.f32.mrb[16].mxu1 }
 0x5db   : > { %v924_v58 = vadd.f32 %v1045_v55, %v923_v57  ;;  %v1137_v59 = vpop.f32.mrb[17].mxu1 }
 0x5dc   : > { %v926_v60 = vpop.f32.mrb[18].mxu1 }
 0x5dd   : > { %v1138_v61 = vpop.f32.mrb[19].mxu1  ;;  %v929_v62 = vadd.f32 %v924_v58, %v317_v56 }
 0x5df   : > { %v932_v63 = vsel %vm342_vm1, %v929_v62, 0.0 }
 0x5e0   : > { %933 = vadd.xlane.f32.xlu0 %v932_v63 }
 0x66d   : > { %v934_v0 = vpop.xlane.xlu0 %933 }
 0x66e   : > { %v936_v2 = vmul.f32 0.03125, %v934_v0 }
 0x670   : > { %v937_v4 = vsub.f32 %v929_v62, %v936_v2 }
 0x672   : > { %v938_v5 = vmul.f32 %v937_v4, %v937_v4 }
 0x674   : > { %v939_v6 = vsel %vm342_vm1, %v938_v5, 0.0 }
 0x675   : > { %940 = vadd.xlane.f32.xlu1 %v939_v6 }
 0x702   : > { %v941_v7 = vpop.xlane.xlu1 %940 }
 0x703   : > { %v942_v8 = vmul.f32 0.03125, %v941_v7 }
 0x705   : > { %v943_v3 = vadd.f32 1e-12, %v942_v8 }
 0x707   : > { %1183 = vrsqrt.f32 %v943_v3 }
 0x711   : > { %v1184_v10 = vpop.eup %1183 }
 0x712   : > { %v945_v12 = vmul.f32 %v1184_v10, %v937_v4 }
 0x714   : > { %v952_v14 = vmul.f32 %v1049_v11, %v945_v12 }
 0x716   : > { %v959_v15 = vadd.f32 %v1050_v13, %v952_v14 }
 0x718   : > { %v960_v16 = vpack.c.bf16 %v959_v15, %v959_v15 }
 0x71a   : > { %962 = vst.msk [vmem:[%s314_s29] sm:$0xf] %vm961_vm7, %v960_v16 }
 0x71b PF: > { %s18_s27 = sadd.s32 1, %s1191_s27  }
 0x71c   : > { %p15_p4 = scmp.ge.s32.totalorder %s18_s27, 4  }
 0x71e   :  { %17 = sbr.rel (!%p15_p4) target bundleno = 1 (0x1), region = 85 }

</bundles_post_ra>
